<compile_context>
chip_gen: v7x
topology: tpu7x:2x2x1
jax: 0.10.0
libtpu: 0.0.40
codegen_flags: <defaults>
</compile_context>

<pallas_src>
import functools
import math

import jax
import jax.numpy as jnp
from jax.experimental import pallas as pl
from jax.experimental.pallas import tpu as pltpu


# ---------------------------------------------------------------------------
# Row layout of the coalesced small-parameter slab (per layer): (16, D) f32
#   0: ln1 gamma   1: ln1 beta
#   2: q bias      3: k bias      4: v bias
#   5: out-proj bias
#   6: ln2 gamma   7: ln2 beta
#   8-11: c_fc bias (4 chunks of D)
#   12: c_proj bias
#   13-15: padding
# ---------------------------------------------------------------------------


# ---------------------------------------------------------------------------
# Pallas kernel: full layer stack for one batch element, one layer per grid step
# ---------------------------------------------------------------------------
def _stack_kernel(x_ref, small_ref, wqkv_ref, wo_ref, wfc_ref, wproj_ref,
                  o_ref, res_ref, heads_ref, *, d_model, n_head):
    hd = d_model // n_head
    scale = 1.0 / math.sqrt(hd)
    eps = 1e-5
    f32 = jnp.float32
    bf16 = jnp.bfloat16

    l_idx = pl.program_id(1)
    n_layers = pl.num_programs(1)

    # Load the residual stream into VMEM scratch at the first layer only.
    @pl.when(l_idx == 0)
    def _():
        res_ref[...] = x_ref[...].astype(f32)

    x = res_ref[...]                                   # (L, D) f32 residual
    L = x.shape[0]
    small = small_ref[...]                             # (16, D) f32 coalesced params

    # --- LayerNorm 1 (f32 stats, fp16-safe LayerNorm semantics) ---
    mu = jnp.mean(x, axis=-1, keepdims=True)
    var = jnp.mean(jnp.square(x - mu), axis=-1, keepdims=True)
    xn = (x - mu) * jax.lax.rsqrt(var + eps) * small[0:1, :] + small[1:2, :]

    # --- QKV projection: bf16 operands, f32 accumulation (biases added per head) ---
    qkv = jnp.dot(xn.astype(bf16), wqkv_ref[...],
                  preferred_element_type=f32)          # (L, 3D) f32

    # --- Multi-head self-attention; head outputs concatenated in VMEM scratch ---
    for h in range(n_head):                            # static unroll (small n_head)
        lo, hi = h * hd, (h + 1) * hd
        q_h = (qkv[:, lo:hi] + small[2:3, lo:hi]).astype(bf16)                        # (L, hd)
        k_h = (qkv[:, d_model + lo:d_model + hi] + small[3:4, lo:hi]).astype(bf16)    # (L, hd)
        v_h = (qkv[:, 2 * d_model + lo:2 * d_model + hi]
               + small[4:5, lo:hi]).astype(bf16)                                      # (L, hd)

        # scores: contract head dim of both operands (no explicit transpose)
        s = jax.lax.dot_general(q_h, k_h, (((1,), (1,)), ((), ())),
                                preferred_element_type=f32) * scale                    # (L, L)
        m = jnp.max(s, axis=-1, keepdims=True)
        p = jnp.exp(s - m)
        r = jnp.sum(p, axis=-1, keepdims=True)                                         # (L, 1)

        o_h = jnp.dot(p.astype(bf16), v_h, preferred_element_type=f32)                 # (L, hd)
        o_h = o_h * pl.reciprocal(r, approx=False)      # exact softmax normalisation

        # concat heads in lanes (masked store hides under MXU slack)
        heads_ref[:, lo:hi] = o_h.astype(bf16)

    # Single full-depth out-projection (K = D) instead of n_head K=hd matmuls.
    attn = jnp.dot(heads_ref[...], wo_ref[...], preferred_element_type=f32)
    x = x + attn + small[5:6, :]                        # residual 1 (+ out-proj bias)

    # --- LayerNorm 2 ---
    mu2 = jnp.mean(x, axis=-1, keepdims=True)
    var2 = jnp.mean(jnp.square(x - mu2), axis=-1, keepdims=True)
    xn2 = ((x - mu2) * jax.lax.rsqrt(var2 + eps) * small[6:7, :]
           + small[7:8, :]).astype(bf16)

    # --- MLP chunked over the 4D hidden dim: c_fc -> QuickGELU -> c_proj ---
    mlp = None
    for c in range(4):                                  # static: 4 chunks of width D
        clo, chi = c * d_model, (c + 1) * d_model
        h1 = jnp.dot(xn2, wfc_ref[:, clo:chi],
                     preferred_element_type=f32) + small[8 + c:9 + c, :]   # (L, D) f32
        h1 = h1 * jax.nn.sigmoid(1.702 * h1)            # QuickGELU (f32 elementwise)
        contrib = jnp.dot(h1.astype(bf16), wproj_ref[clo:chi, :],
                          preferred_element_type=f32)
        mlp = contrib if mlp is None else mlp + contrib
    x = x + mlp + small[12:13, :]                       # residual 2 (+ c_proj bias)

    res_ref[...] = x                                    # carry residual to next layer

    @pl.when(l_idx == n_layers - 1)
    def _():
        o_ref[...] = x.astype(o_ref.dtype)


# ---------------------------------------------------------------------------
# Generation-aware VMEM budget
# ---------------------------------------------------------------------------
def _hw_vmem_bytes():
    try:
        info = pltpu.get_tpu_info()
        for attr in ("vmem_capacity_bytes", "vmem_size_bytes", "vmem_bytes"):
            v = getattr(info, attr, None)
            if v:
                return int(v)
    except Exception:
        pass
    return 64 << 20                                     # conservative (v7x per-TC)


def _vmem_limit_bytes(L, D):
    # bf16 weights per layer (12*D^2 elems) double-buffered along the layer axis
    weights = 2 * (12 * D * D * 2 + 16 * D * 4)
    x_io = 2 * 2 * L * D * 4                            # double-buffered x / out tiles
    scratch = L * D * 4 + L * D * 2                     # f32 residual + bf16 head concat
    inter = (3 * L * D + L * L + 8 * L * D) * 4         # qkv, scores, misc f32 temporaries
    est = weights + x_io + scratch + inter
    cap = _hw_vmem_bytes() - (8 << 20)                  # leave compiler headroom
    return int(min(max(int(1.3 * est), 16 << 20), cap))


# ---------------------------------------------------------------------------
# Public wrapper: one pallas_call for the whole stack
# ---------------------------------------------------------------------------
def temporal_modelling(x_lnd, params, d_model, n_head):
    # x_lnd: (L, N, D) -- seq-first like the PyTorch module
    L, N, D = x_lnd.shape
    assert D == d_model and d_model % n_head == 0
    n_layers = params["wqkv"].shape[0]
    x = jnp.transpose(x_lnd, (1, 0, 2))                 # (N, L, D) for the kernel

    kern = functools.partial(_stack_kernel, d_model=d_model, n_head=n_head)
    out = pl.pallas_call(
        kern,
        out_shape=jax.ShapeDtypeStruct((N, L, D), x.dtype),
        grid=(N, n_layers),
        in_specs=[
            pl.BlockSpec((None, L, D), lambda b, l: (b, 0, 0)),          # x (batch-indexed)
            pl.BlockSpec((None, 16, D), lambda b, l: (l, 0, 0)),         # coalesced small params
            pl.BlockSpec((None, D, 3 * D), lambda b, l: (l, 0, 0)),      # wqkv
            pl.BlockSpec((None, D, D), lambda b, l: (l, 0, 0)),          # wo
            pl.BlockSpec((None, D, 4 * D), lambda b, l: (l, 0, 0)),      # wfc
            pl.BlockSpec((None, 4 * D, D), lambda b, l: (l, 0, 0)),      # wproj
        ],
        out_specs=pl.BlockSpec((None, L, D), lambda b, l: (b, 0, 0)),
        scratch_shapes=[
            pltpu.VMEM((L, D), jnp.float32),            # residual carried across layers
            pltpu.VMEM((L, D), jnp.bfloat16),           # concatenated head outputs
        ],
        compiler_params=pltpu.CompilerParams(
            dimension_semantics=("parallel", "arbitrary"),
            vmem_limit_bytes=_vmem_limit_bytes(L, D)),
    )(x, params["small"], params["wqkv"], params["wo"],
      params["wfc"], params["wproj"])

    return jnp.transpose(out, (1, 0, 2))                # back to (L, N, D)


# ---------------------------------------------------------------------------
# Deterministic parameter init
#   weight matrices pre-transposed to (in, out), stored bf16; small params f32,
#   coalesced into a (16, D) slab per layer; all stacked over the layer dim.
# ---------------------------------------------------------------------------
def init_block_params(key, d_model):
    D = d_model
    ks = jax.random.split(key, 6)
    s = 0.02
    bf16 = jnp.bfloat16
    wqkv = (s * jax.random.normal(ks[0], (D, 3 * D), jnp.float32)).astype(bf16)
    bqkv = s * jax.random.normal(ks[1], (3 * D,), jnp.float32)
    wo = (s * jax.random.normal(ks[2], (D, D), jnp.float32)).astype(bf16)
    wfc = (s * jax.random.normal(ks[3], (D, 4 * D), jnp.float32)).astype(bf16)
    bfc = s * jax.random.normal(ks[4], (4 * D,), jnp.float32)
    wproj = (s * jax.random.normal(ks[5], (4 * D, D), jnp.float32)).astype(bf16)
    zeros = jnp.zeros((D,), jnp.float32)
    ones = jnp.ones((D,), jnp.float32)
    small = jnp.stack([
        ones, zeros,                                    # ln1 gamma / beta
        bqkv[:D], bqkv[D:2 * D], bqkv[2 * D:],          # q / k / v bias
        zeros,                                          # out-proj bias
        ones, zeros,                                    # ln2 gamma / beta
        bfc[:D], bfc[D:2 * D], bfc[2 * D:3 * D], bfc[3 * D:],   # c_fc bias
        zeros,                                          # c_proj bias
        zeros, zeros, zeros,                            # padding to 16 rows
    ])
    return {"wqkv": wqkv, "wo": wo, "wfc": wfc, "wproj": wproj, "small": small}


def init_stacked_params(key, d_model, n_layers):
    keys = jax.random.split(key, n_layers)
    per = [init_block_params(k, d_model) for k in keys]
    return {name: jnp.stack([p[name] for p in per]) for name in per[0]}


# ---------------------------------------------------------------------------
# Pure-JAX f32 reference (same weight values) for a correctness check
# ---------------------------------------------------------------------------
def _ref_block(x, params, l, d_model, n_head):
    f32 = jnp.float32
    small = params["small"][l]
    wqkv = params["wqkv"][l].astype(f32)
    wo = params["wo"][l].astype(f32)
    wfc = params["wfc"][l].astype(f32)
    wproj = params["wproj"][l].astype(f32)
    ln1_g, ln1_b = small[0], small[1]
    bqkv = jnp.concatenate([small[2], small[3], small[4]])
    bo = small[5]
    ln2_g, ln2_b = small[6], small[7]
    bfc = jnp.concatenate([small[8], small[9], small[10], small[11]])
    bproj = small[12]
    hd = d_model // n_head
    eps = 1e-5

    def ln(z, g, b):
        mu = jnp.mean(z, -1, keepdims=True)
        var = jnp.mean(jnp.square(z - mu), -1, keepdims=True)
        return (z - mu) * jax.lax.rsqrt(var + eps) * g + b

    xn = ln(x, ln1_g, ln1_b)
    qkv = xn @ wqkv + bqkv
    q, k, v = jnp.split(qkv, 3, axis=-1)
    N, L, _ = x.shape
    q = q.reshape(N, L, n_head, hd).transpose(0, 2, 1, 3) / math.sqrt(hd)
    k = k.reshape(N, L, n_head, hd).transpose(0, 2, 1, 3)
    v = v.reshape(N, L, n_head, hd).transpose(0, 2, 1, 3)
    s = jnp.einsum("nhqd,nhkd->nhqk", q, k)
    p = jax.nn.softmax(s, axis=-1)
    o = jnp.einsum("nhqk,nhkd->nhqd", p, v).transpose(0, 2, 1, 3).reshape(N, L, d_model)
    x = x + (o @ wo + bo)
    xn2 = ln(x, ln2_g, ln2_b)
    h1 = xn2 @ wfc + bfc
    h1 = h1 * jax.nn.sigmoid(1.702 * h1)
    return x + (h1 @ wproj + bproj)


def temporal_modelling_ref(x_lnd, params, d_model, n_head):
    x = jnp.transpose(x_lnd, (1, 0, 2)).astype(jnp.float32)
    for l in range(params["wqkv"].shape[0]):
        x = _ref_block(x, params, l, d_model, n_head)
    return jnp.transpose(x, (1, 0, 2))


if __name__ == "__main__":
    # Small but lane-dense shapes: D multiple of 128, L multiple of 8.
    width, layers, heads = 128, 2, 2           # d_model, n_layers, n_heads (hd = 64)
    seq_len, batch = 8, 2

    key = jax.random.PRNGKey(0)
    kx, kp = jax.random.split(key)
    x = jax.random.normal(kx, (seq_len, batch, width), jnp.float32)   # (L, N, D)
    params = init_stacked_params(kp, width, layers)

    out = temporal_modelling(x, params, width, heads)
    out = jax.block_until_ready(out)

    ref = temporal_modelling_ref(x, params, width, heads)
    assert out.shape == (seq_len, batch, width)
    # bf16 MXU operands (q/k/v/p/weights) -> looser tolerance than pure f32.
    assert jnp.allclose(out, ref, rtol=3e-2, atol=3e-2), "mismatch vs reference"

    print("KERNEL_OK")
</pallas_src>

<mosaic_0001>
module attributes {stable_mosaic.version = 11 : i64} {
  func.func @_stack_kernel(%arg0: i32, %arg1: i32, %arg2: memref<1x8x128xf32, #tpu.memory_space<vmem>>, %arg3: memref<1x16x128xf32, #tpu.memory_space<vmem>>, %arg4: memref<1x128x384xbf16, #tpu.memory_space<vmem>>, %arg5: memref<1x128x128xbf16, #tpu.memory_space<vmem>>, %arg6: memref<1x128x512xbf16, #tpu.memory_space<vmem>>, %arg7: memref<1x512x128xbf16, #tpu.memory_space<vmem>>, %arg8: memref<1x8x128xf32, #tpu.memory_space<vmem>>, %arg9: memref<8x128xf32, #tpu.memory_space<vmem>>, %arg10: memref<8x128xbf16, #tpu.memory_space<vmem>>) attributes {dimension_semantics = [#tpu.dimension_semantics<parallel>, #tpu.dimension_semantics<arbitrary>], iteration_bounds = array<i64: 2, 2>, scalar_prefetch = 0 : i64, scratch_operands = 2 : i64, tpu.core_type = #tpu.core_type<tc>, window_params = [{transform_indices = @transform_0, window_bounds = array<i64: 1, 8, 128>}, {transform_indices = @transform_1, window_bounds = array<i64: 1, 16, 128>}, {transform_indices = @transform_2, window_bounds = array<i64: 1, 128, 384>}, {transform_indices = @transform_3, window_bounds = array<i64: 1, 128, 128>}, {transform_indices = @transform_4, window_bounds = array<i64: 1, 128, 512>}, {transform_indices = @transform_5, window_bounds = array<i64: 1, 512, 128>}, {transform_indices = @transform_6, window_bounds = array<i64: 1, 8, 128>}]} {
    %c0_i32 = arith.constant 0 : i32
    %0 = arith.cmpi eq, %arg1, %c0_i32 : i32
    %1 = arith.extui %0 : i1 to i32
    %c0_i32_0 = arith.constant 0 : i32
    %2 = arith.cmpi ne, %1, %c0_i32_0 : i32
    scf.if %2 {
      %c0_77 = arith.constant 0 : index
      %c0_78 = arith.constant 0 : index
      %c0_79 = arith.constant 0 : index
      %214 = vector.load %arg2[%c0_77, %c0_78, %c0_79] : memref<1x8x128xf32, #tpu.memory_space<vmem>>, vector<1x8x128xf32>
      %215 = vector.shape_cast %214 : vector<1x8x128xf32> to vector<8x128xf32>
      %c0_80 = arith.constant 0 : index
      %c0_81 = arith.constant 0 : index
      %216 = vector.load %arg9[%c0_80, %c0_81] : memref<8x128xf32, #tpu.memory_space<vmem>>, vector<8x128xf32>
      tpu.vector_store %arg9[%c0_80, %c0_81], %215 {strides = array<i32>} : memref<8x128xf32, #tpu.memory_space<vmem>>, vector<8x128xf32>,
    } else {
    }
    %c0 = arith.constant 0 : index
    %c0_1 = arith.constant 0 : index
    %3 = vector.load %arg9[%c0, %c0_1] : memref<8x128xf32, #tpu.memory_space<vmem>>, vector<8x128xf32>
    %c0_2 = arith.constant 0 : index
    %c0_3 = arith.constant 0 : index
    %c0_4 = arith.constant 0 : index
    %4 = vector.load %arg3[%c0_2, %c0_3, %c0_4] : memref<1x16x128xf32, #tpu.memory_space<vmem>>, vector<1x16x128xf32>
    %5 = vector.shape_cast %4 : vector<1x16x128xf32> to vector<16x128xf32>
    %cst = arith.constant dense<0.000000e+00> : vector<8xf32>
    %6 = vector.multi_reduction <add>, %3, %cst [1] : vector<8x128xf32> to vector<8xf32>
    %7 = vector.shape_cast %6 : vector<8xf32> to vector<8x1xf32>
    %cst_5 = arith.constant 1.280000e+02 : f32
    %8 = vector.broadcast %cst_5 : f32 to vector<8x1xf32>
    %9 = arith.divf %7, %8 : vector<8x1xf32>
    %10 = vector.broadcast %9 : vector<8x1xf32> to vector<8x128xf32>
    %11 = arith.subf %3, %10 : vector<8x128xf32>
    %12 = arith.mulf %11, %11 : vector<8x128xf32>
    %cst_6 = arith.constant dense<0.000000e+00> : vector<8xf32>
    %13 = vector.multi_reduction <add>, %12, %cst_6 [1] : vector<8x128xf32> to vector<8xf32>
    %14 = vector.shape_cast %13 : vector<8xf32> to vector<8x1xf32>
    %cst_7 = arith.constant 1.280000e+02 : f32
    %15 = vector.broadcast %cst_7 : f32 to vector<8x1xf32>
    %16 = arith.divf %14, %15 : vector<8x1xf32>
    %17 = vector.broadcast %9 : vector<8x1xf32> to vector<8x128xf32>
    %18 = arith.subf %3, %17 : vector<8x128xf32>
    %cst_8 = arith.constant 9.99999974E-6 : f32
    %19 = vector.broadcast %cst_8 : f32 to vector<8x1xf32>
    %20 = arith.addf %16, %19 : vector<8x1xf32>
    %21 = math.rsqrt %20 : vector<8x1xf32>
    %22 = vector.broadcast %21 : vector<8x1xf32> to vector<8x128xf32>
    %23 = arith.mulf %18, %22 : vector<8x128xf32>
    %24 = vector.extract_strided_slice %5 {offsets = [0, 0], sizes = [1, 128], strides = [1, 1]} : vector<16x128xf32> to vector<1x128xf32>
    %25 = vector.broadcast %24 : vector<1x128xf32> to vector<8x128xf32>
    %26 = arith.mulf %23, %25 : vector<8x128xf32>
    %27 = vector.extract_strided_slice %5 {offsets = [1, 0], sizes = [1, 128], strides = [1, 1]} : vector<16x128xf32> to vector<1x128xf32>
    %28 = vector.broadcast %27 : vector<1x128xf32> to vector<8x128xf32>
    %29 = arith.addf %26, %28 : vector<8x128xf32>
    %30 = arith.truncf %29 : vector<8x128xf32> to vector<8x128xbf16>
    %c0_9 = arith.constant 0 : index
    %c0_10 = arith.constant 0 : index
    %c0_11 = arith.constant 0 : index
    %31 = vector.load %arg4[%c0_9, %c0_10, %c0_11] : memref<1x128x384xbf16, #tpu.memory_space<vmem>>, vector<1x128x384xbf16>
    %32 = vector.shape_cast %31 : vector<1x128x384xbf16> to vector<128x384xbf16>
    %cst_12 = arith.constant dense<0.000000e+00> : vector<8x384xf32>
    %33 = tpu.matmul %30, %32, %cst_12 {dimension_numbers = #tpu.dot_dimension_numbers<[1], [0], [0], [1], [0, 0, 1, 1], [], []>} : vector<8x128xbf16>, vector<128x384xbf16>, vector<8x384xf32> -> vector<8x384xf32>
    %34 = vector.extract_strided_slice %33 {offsets = [0, 0], sizes = [8, 64], strides = [1, 1]} : vector<8x384xf32> to vector<8x64xf32>
    %35 = vector.extract_strided_slice %5 {offsets = [2, 0], sizes = [1, 64], strides = [1, 1]} : vector<16x128xf32> to vector<1x64xf32>
    %36 = vector.broadcast %35 : vector<1x64xf32> to vector<8x64xf32>
    %37 = arith.addf %34, %36 : vector<8x64xf32>
    %38 = arith.truncf %37 : vector<8x64xf32> to vector<8x64xbf16>
    %39 = vector.extract_strided_slice %33 {offsets = [0, 128], sizes = [8, 64], strides = [1, 1]} : vector<8x384xf32> to vector<8x64xf32>
    %40 = vector.extract_strided_slice %5 {offsets = [3, 0], sizes = [1, 64], strides = [1, 1]} : vector<16x128xf32> to vector<1x64xf32>
    %41 = vector.broadcast %40 : vector<1x64xf32> to vector<8x64xf32>
    %42 = arith.addf %39, %41 : vector<8x64xf32>
    %43 = arith.truncf %42 : vector<8x64xf32> to vector<8x64xbf16>
    %44 = vector.extract_strided_slice %33 {offsets = [0, 256], sizes = [8, 64], strides = [1, 1]} : vector<8x384xf32> to vector<8x64xf32>
    %45 = vector.extract_strided_slice %5 {offsets = [4, 0], sizes = [1, 64], strides = [1, 1]} : vector<16x128xf32> to vector<1x64xf32>
    %46 = vector.broadcast %45 : vector<1x64xf32> to vector<8x64xf32>
    %47 = arith.addf %44, %46 : vector<8x64xf32>
    %48 = arith.truncf %47 : vector<8x64xf32> to vector<8x64xbf16>
    %cst_13 = arith.constant dense<0.000000e+00> : vector<8x8xf32>
    %49 = tpu.matmul %38, %43, %cst_13 {dimension_numbers = #tpu.dot_dimension_numbers<[1], [1], [0], [0], [0, 0, 1, 0], [], []>} : vector<8x64xbf16>, vector<8x64xbf16>, vector<8x8xf32> -> vector<8x8xf32>
    %cst_14 = arith.constant 1.250000e-01 : f32
    %50 = vector.broadcast %cst_14 : f32 to vector<8x8xf32>
    %51 = arith.mulf %49, %50 : vector<8x8xf32>
    %cst_15 = arith.constant dense<0xFF800000> : vector<8xf32>
    %52 = vector.multi_reduction <maximumf>, %51, %cst_15 [1] : vector<8x8xf32> to vector<8xf32>
    %53 = vector.shape_cast %52 : vector<8xf32> to vector<8x1xf32>
    %54 = vector.broadcast %53 : vector<8x1xf32> to vector<8x8xf32>
    %55 = arith.subf %51, %54 : vector<8x8xf32>
    %56 = math.exp %55 : vector<8x8xf32>
    %cst_16 = arith.constant dense<0.000000e+00> : vector<8xf32>
    %57 = vector.multi_reduction <add>, %56, %cst_16 [1] : vector<8x8xf32> to vector<8xf32>
    %58 = vector.shape_cast %57 : vector<8xf32> to vector<8x1xf32>
    %59 = arith.truncf %56 : vector<8x8xf32> to vector<8x8xbf16>
    %cst_17 = arith.constant dense<0.000000e+00> : vector<8x64xf32>
    %60 = tpu.matmul %59, %48, %cst_17 {dimension_numbers = #tpu.dot_dimension_numbers<[1], [0], [0], [1], [0, 0, 1, 1], [], []>} : vector<8x8xbf16>, vector<8x64xbf16>, vector<8x64xf32> -> vector<8x64xf32>
    %61 = tpu.reciprocal %58 : vector<8x1xf32> -> vector<8x1xf32>
    %62 = vector.broadcast %61 : vector<8x1xf32> to vector<8x64xf32>
    %63 = arith.mulf %60, %62 : vector<8x64xf32>
    %64 = arith.truncf %63 : vector<8x64xf32> to vector<8x64xbf16>
    %c0_18 = arith.constant 0 : index
    %c0_19 = arith.constant 0 : index
    %65 = vector.load %arg10[%c0_18, %c0_19] : memref<8x128xbf16, #tpu.memory_space<vmem>>, vector<8x64xbf16>
    tpu.vector_store %arg10[%c0_18, %c0_19], %64 {strides = array<i32>} : memref<8x128xbf16, #tpu.memory_space<vmem>>, vector<8x64xbf16>,
    %66 = vector.extract_strided_slice %33 {offsets = [0, 64], sizes = [8, 64], strides = [1, 1]} : vector<8x384xf32> to vector<8x64xf32>
    %67 = vector.extract_strided_slice %5 {offsets = [2, 64], sizes = [1, 64], strides = [1, 1]} : vector<16x128xf32> to vector<1x64xf32>
    %68 = vector.broadcast %67 : vector<1x64xf32> to vector<8x64xf32>
    %69 = arith.addf %66, %68 : vector<8x64xf32>
    %70 = arith.truncf %69 : vector<8x64xf32> to vector<8x64xbf16>
    %71 = vector.extract_strided_slice %33 {offsets = [0, 192], sizes = [8, 64], strides = [1, 1]} : vector<8x384xf32> to vector<8x64xf32>
    %72 = vector.extract_strided_slice %5 {offsets = [3, 64], sizes = [1, 64], strides = [1, 1]} : vector<16x128xf32> to vector<1x64xf32>
    %73 = vector.broadcast %72 : vector<1x64xf32> to vector<8x64xf32>
    %74 = arith.addf %71, %73 : vector<8x64xf32>
    %75 = arith.truncf %74 : vector<8x64xf32> to vector<8x64xbf16>
    %76 = vector.extract_strided_slice %33 {offsets = [0, 320], sizes = [8, 64], strides = [1, 1]} : vector<8x384xf32> to vector<8x64xf32>
    %77 = vector.extract_strided_slice %5 {offsets = [4, 64], sizes = [1, 64], strides = [1, 1]} : vector<16x128xf32> to vector<1x64xf32>
    %78 = vector.broadcast %77 : vector<1x64xf32> to vector<8x64xf32>
    %79 = arith.addf %76, %78 : vector<8x64xf32>
    %80 = arith.truncf %79 : vector<8x64xf32> to vector<8x64xbf16>
    %cst_20 = arith.constant dense<0.000000e+00> : vector<8x8xf32>
    %81 = tpu.matmul %70, %75, %cst_20 {dimension_numbers = #tpu.dot_dimension_numbers<[1], [1], [0], [0], [0, 0, 1, 0], [], []>} : vector<8x64xbf16>, vector<8x64xbf16>, vector<8x8xf32> -> vector<8x8xf32>
    %cst_21 = arith.constant 1.250000e-01 : f32
    %82 = vector.broadcast %cst_21 : f32 to vector<8x8xf32>
    %83 = arith.mulf %81, %82 : vector<8x8xf32>
    %cst_22 = arith.constant dense<0xFF800000> : vector<8xf32>
    %84 = vector.multi_reduction <maximumf>, %83, %cst_22 [1] : vector<8x8xf32> to vector<8xf32>
    %85 = vector.shape_cast %84 : vector<8xf32> to vector<8x1xf32>
    %86 = vector.broadcast %85 : vector<8x1xf32> to vector<8x8xf32>
    %87 = arith.subf %83, %86 : vector<8x8xf32>
    %88 = math.exp %87 : vector<8x8xf32>
    %cst_23 = arith.constant dense<0.000000e+00> : vector<8xf32>
    %89 = vector.multi_reduction <add>, %88, %cst_23 [1] : vector<8x8xf32> to vector<8xf32>
    %90 = vector.shape_cast %89 : vector<8xf32> to vector<8x1xf32>
    %91 = arith.truncf %88 : vector<8x8xf32> to vector<8x8xbf16>
    %cst_24 = arith.constant dense<0.000000e+00> : vector<8x64xf32>
    %92 = tpu.matmul %91, %80, %cst_24 {dimension_numbers = #tpu.dot_dimension_numbers<[1], [0], [0], [1], [0, 0, 1, 1], [], []>} : vector<8x8xbf16>, vector<8x64xbf16>, vector<8x64xf32> -> vector<8x64xf32>
    %93 = tpu.reciprocal %90 : vector<8x1xf32> -> vector<8x1xf32>
    %94 = vector.broadcast %93 : vector<8x1xf32> to vector<8x64xf32>
    %95 = arith.mulf %92, %94 : vector<8x64xf32>
    %96 = arith.truncf %95 : vector<8x64xf32> to vector<8x64xbf16>
    %c0_25 = arith.constant 0 : index
    %c64 = arith.constant 64 : index
    %97 = vector.load %arg10[%c0_25, %c64] : memref<8x128xbf16, #tpu.memory_space<vmem>>, vector<8x64xbf16>
    tpu.vector_store %arg10[%c0_25, %c64], %96 {strides = array<i32>} : memref<8x128xbf16, #tpu.memory_space<vmem>>, vector<8x64xbf16>,
    %c0_26 = arith.constant 0 : index
    %c0_27 = arith.constant 0 : index
    %98 = vector.load %arg10[%c0_26, %c0_27] : memref<8x128xbf16, #tpu.memory_space<vmem>>, vector<8x128xbf16>
    %c0_28 = arith.constant 0 : index
    %c0_29 = arith.constant 0 : index
    %c0_30 = arith.constant 0 : index
    %99 = vector.load %arg5[%c0_28, %c0_29, %c0_30] : memref<1x128x128xbf16, #tpu.memory_space<vmem>>, vector<1x128x128xbf16>
    %100 = vector.shape_cast %99 : vector<1x128x128xbf16> to vector<128x128xbf16>
    %cst_31 = arith.constant dense<0.000000e+00> : vector<8x128xf32>
    %101 = tpu.matmul %98, %100, %cst_31 {dimension_numbers = #tpu.dot_dimension_numbers<[1], [0], [0], [1], [0, 0, 1, 1], [], []>} : vector<8x128xbf16>, vector<128x128xbf16>, vector<8x128xf32> -> vector<8x128xf32>
    %102 = arith.addf %3, %101 : vector<8x128xf32>
    %103 = vector.extract_strided_slice %5 {offsets = [5, 0], sizes = [1, 128], strides = [1, 1]} : vector<16x128xf32> to vector<1x128xf32>
    %104 = vector.broadcast %103 : vector<1x128xf32> to vector<8x128xf32>
    %105 = arith.addf %102, %104 : vector<8x128xf32>
    %cst_32 = arith.constant dense<0.000000e+00> : vector<8xf32>
    %106 = vector.multi_reduction <add>, %105, %cst_32 [1] : vector<8x128xf32> to vector<8xf32>
    %107 = vector.shape_cast %106 : vector<8xf32> to vector<8x1xf32>
    %cst_33 = arith.constant 1.280000e+02 : f32
    %108 = vector.broadcast %cst_33 : f32 to vector<8x1xf32>
    %109 = arith.divf %107, %108 : vector<8x1xf32>
    %110 = vector.broadcast %109 : vector<8x1xf32> to vector<8x128xf32>
    %111 = arith.subf %105, %110 : vector<8x128xf32>
    %112 = arith.mulf %111, %111 : vector<8x128xf32>
    %cst_34 = arith.constant dense<0.000000e+00> : vector<8xf32>
    %113 = vector.multi_reduction <add>, %112, %cst_34 [1] : vector<8x128xf32> to vector<8xf32>
    %114 = vector.shape_cast %113 : vector<8xf32> to vector<8x1xf32>
    %cst_35 = arith.constant 1.280000e+02 : f32
    %115 = vector.broadcast %cst_35 : f32 to vector<8x1xf32>
    %116 = arith.divf %114, %115 : vector<8x1xf32>
    %117 = vector.broadcast %109 : vector<8x1xf32> to vector<8x128xf32>
    %118 = arith.subf %105, %117 : vector<8x128xf32>
    %cst_36 = arith.constant 9.99999974E-6 : f32
    %119 = vector.broadcast %cst_36 : f32 to vector<8x1xf32>
    %120 = arith.addf %116, %119 : vector<8x1xf32>
    %121 = math.rsqrt %120 : vector<8x1xf32>
    %122 = vector.broadcast %121 : vector<8x1xf32> to vector<8x128xf32>
    %123 = arith.mulf %118, %122 : vector<8x128xf32>
    %124 = vector.extract_strided_slice %5 {offsets = [6, 0], sizes = [1, 128], strides = [1, 1]} : vector<16x128xf32> to vector<1x128xf32>
    %125 = vector.broadcast %124 : vector<1x128xf32> to vector<8x128xf32>
    %126 = arith.mulf %123, %125 : vector<8x128xf32>
    %127 = vector.extract_strided_slice %5 {offsets = [7, 0], sizes = [1, 128], strides = [1, 1]} : vector<16x128xf32> to vector<1x128xf32>
    %128 = vector.broadcast %127 : vector<1x128xf32> to vector<8x128xf32>
    %129 = arith.addf %126, %128 : vector<8x128xf32>
    %130 = arith.truncf %129 : vector<8x128xf32> to vector<8x128xbf16>
    %c0_37 = arith.constant 0 : index
    %c0_38 = arith.constant 0 : index
    %c0_39 = arith.constant 0 : index
    %131 = vector.load %arg6[%c0_37, %c0_38, %c0_39] : memref<1x128x512xbf16, #tpu.memory_space<vmem>>, vector<1x128x128xbf16>
    %132 = vector.shape_cast %131 : vector<1x128x128xbf16> to vector<128x128xbf16>
    %cst_40 = arith.constant dense<0.000000e+00> : vector<8x128xf32>
    %133 = tpu.matmul %130, %132, %cst_40 {dimension_numbers = #tpu.dot_dimension_numbers<[1], [0], [0], [1], [0, 0, 1, 1], [], []>} : vector<8x128xbf16>, vector<128x128xbf16>, vector<8x128xf32> -> vector<8x128xf32>
    %134 = vector.extract_strided_slice %5 {offsets = [8, 0], sizes = [1, 128], strides = [1, 1]} : vector<16x128xf32> to vector<1x128xf32>
    %135 = vector.broadcast %134 : vector<1x128xf32> to vector<8x128xf32>
    %136 = arith.addf %133, %135 : vector<8x128xf32>
    %cst_41 = arith.constant 1.702000e+00 : f32
    %137 = vector.broadcast %cst_41 : f32 to vector<8x128xf32>
    %138 = arith.mulf %137, %136 : vector<8x128xf32>
    %139 = arith.negf %138 : vector<8x128xf32>
    %140 = math.exp %139 : vector<8x128xf32>
    %cst_42 = arith.constant 1.000000e+00 : f32
    %141 = vector.broadcast %cst_42 : f32 to vector<8x128xf32>
    %142 = arith.addf %141, %140 : vector<8x128xf32>
    %143 = arith.divf %141, %142 : vector<8x128xf32>
    %144 = arith.mulf %136, %143 : vector<8x128xf32>
    %145 = arith.truncf %144 : vector<8x128xf32> to vector<8x128xbf16>
    %c0_43 = arith.constant 0 : index
    %c0_44 = arith.constant 0 : index
    %c0_45 = arith.constant 0 : index
    %146 = vector.load %arg7[%c0_43, %c0_44, %c0_45] : memref<1x512x128xbf16, #tpu.memory_space<vmem>>, vector<1x128x128xbf16>
    %147 = vector.shape_cast %146 : vector<1x128x128xbf16> to vector<128x128xbf16>
    %cst_46 = arith.constant dense<0.000000e+00> : vector<8x128xf32>
    %148 = tpu.matmul %145, %147, %cst_46 {dimension_numbers = #tpu.dot_dimension_numbers<[1], [0], [0], [1], [0, 0, 1, 1], [], []>} : vector<8x128xbf16>, vector<128x128xbf16>, vector<8x128xf32> -> vector<8x128xf32>
    %c0_47 = arith.constant 0 : index
    %c0_48 = arith.constant 0 : index
    %c128 = arith.constant 128 : index
    %149 = vector.load %arg6[%c0_47, %c0_48, %c128] : memref<1x128x512xbf16, #tpu.memory_space<vmem>>, vector<1x128x128xbf16>
    %150 = vector.shape_cast %149 : vector<1x128x128xbf16> to vector<128x128xbf16>
    %cst_49 = arith.constant dense<0.000000e+00> : vector<8x128xf32>
    %151 = tpu.matmul %130, %150, %cst_49 {dimension_numbers = #tpu.dot_dimension_numbers<[1], [0], [0], [1], [0, 0, 1, 1], [], []>} : vector<8x128xbf16>, vector<128x128xbf16>, vector<8x128xf32> -> vector<8x128xf32>
    %152 = vector.extract_strided_slice %5 {offsets = [9, 0], sizes = [1, 128], strides = [1, 1]} : vector<16x128xf32> to vector<1x128xf32>
    %153 = vector.broadcast %152 : vector<1x128xf32> to vector<8x128xf32>
    %154 = arith.addf %151, %153 : vector<8x128xf32>
    %cst_50 = arith.constant 1.702000e+00 : f32
    %155 = vector.broadcast %cst_50 : f32 to vector<8x128xf32>
    %156 = arith.mulf %155, %154 : vector<8x128xf32>
    %157 = arith.negf %156 : vector<8x128xf32>
    %158 = math.exp %157 : vector<8x128xf32>
    %cst_51 = arith.constant 1.000000e+00 : f32
    %159 = vector.broadcast %cst_51 : f32 to vector<8x128xf32>
    %160 = arith.addf %159, %158 : vector<8x128xf32>
    %161 = arith.divf %159, %160 : vector<8x128xf32>
    %162 = arith.mulf %154, %161 : vector<8x128xf32>
    %163 = arith.truncf %162 : vector<8x128xf32> to vector<8x128xbf16>
    %c0_52 = arith.constant 0 : index
    %c128_53 = arith.constant 128 : index
    %c0_54 = arith.constant 0 : index
    %164 = vector.load %arg7[%c0_52, %c128_53, %c0_54] : memref<1x512x128xbf16, #tpu.memory_space<vmem>>, vector<1x128x128xbf16>
    %165 = vector.shape_cast %164 : vector<1x128x128xbf16> to vector<128x128xbf16>
    %cst_55 = arith.constant dense<0.000000e+00> : vector<8x128xf32>
    %166 = tpu.matmul %163, %165, %cst_55 {dimension_numbers = #tpu.dot_dimension_numbers<[1], [0], [0], [1], [0, 0, 1, 1], [], []>} : vector<8x128xbf16>, vector<128x128xbf16>, vector<8x128xf32> -> vector<8x128xf32>
    %167 = arith.addf %148, %166 : vector<8x128xf32>
    %c0_56 = arith.constant 0 : index
    %c0_57 = arith.constant 0 : index
    %c256 = arith.constant 256 : index
    %168 = vector.load %arg6[%c0_56, %c0_57, %c256] : memref<1x128x512xbf16, #tpu.memory_space<vmem>>, vector<1x128x128xbf16>
    %169 = vector.shape_cast %168 : vector<1x128x128xbf16> to vector<128x128xbf16>
    %cst_58 = arith.constant dense<0.000000e+00> : vector<8x128xf32>
    %170 = tpu.matmul %130, %169, %cst_58 {dimension_numbers = #tpu.dot_dimension_numbers<[1], [0], [0], [1], [0, 0, 1, 1], [], []>} : vector<8x128xbf16>, vector<128x128xbf16>, vector<8x128xf32> -> vector<8x128xf32>
    %171 = vector.extract_strided_slice %5 {offsets = [10, 0], sizes = [1, 128], strides = [1, 1]} : vector<16x128xf32> to vector<1x128xf32>
    %172 = vector.broadcast %171 : vector<1x128xf32> to vector<8x128xf32>
    %173 = arith.addf %170, %172 : vector<8x128xf32>
    %cst_59 = arith.constant 1.702000e+00 : f32
    %174 = vector.broadcast %cst_59 : f32 to vector<8x128xf32>
    %175 = arith.mulf %174, %173 : vector<8x128xf32>
    %176 = arith.negf %175 : vector<8x128xf32>
    %177 = math.exp %176 : vector<8x128xf32>
    %cst_60 = arith.constant 1.000000e+00 : f32
    %178 = vector.broadcast %cst_60 : f32 to vector<8x128xf32>
    %179 = arith.addf %178, %177 : vector<8x128xf32>
    %180 = arith.divf %178, %179 : vector<8x128xf32>
    %181 = arith.mulf %173, %180 : vector<8x128xf32>
    %182 = arith.truncf %181 : vector<8x128xf32> to vector<8x128xbf16>
    %c0_61 = arith.constant 0 : index
    %c256_62 = arith.constant 256 : index
    %c0_63 = arith.constant 0 : index
    %183 = vector.load %arg7[%c0_61, %c256_62, %c0_63] : memref<1x512x128xbf16, #tpu.memory_space<vmem>>, vector<1x128x128xbf16>
    %184 = vector.shape_cast %183 : vector<1x128x128xbf16> to vector<128x128xbf16>
    %cst_64 = arith.constant dense<0.000000e+00> : vector<8x128xf32>
    %185 = tpu.matmul %182, %184, %cst_64 {dimension_numbers = #tpu.dot_dimension_numbers<[1], [0], [0], [1], [0, 0, 1, 1], [], []>} : vector<8x128xbf16>, vector<128x128xbf16>, vector<8x128xf32> -> vector<8x128xf32>
    %186 = arith.addf %167, %185 : vector<8x128xf32>
    %c0_65 = arith.constant 0 : index
    %c0_66 = arith.constant 0 : index
    %c384 = arith.constant 384 : index
    %187 = vector.load %arg6[%c0_65, %c0_66, %c384] : memref<1x128x512xbf16, #tpu.memory_space<vmem>>, vector<1x128x128xbf16>
    %188 = vector.shape_cast %187 : vector<1x128x128xbf16> to vector<128x128xbf16>
    %cst_67 = arith.constant dense<0.000000e+00> : vector<8x128xf32>
    %189 = tpu.matmul %130, %188, %cst_67 {dimension_numbers = #tpu.dot_dimension_numbers<[1], [0], [0], [1], [0, 0, 1, 1], [], []>} : vector<8x128xbf16>, vector<128x128xbf16>, vector<8x128xf32> -> vector<8x128xf32>
    %190 = vector.extract_strided_slice %5 {offsets = [11, 0], sizes = [1, 128], strides = [1, 1]} : vector<16x128xf32> to vector<1x128xf32>
    %191 = vector.broadcast %190 : vector<1x128xf32> to vector<8x128xf32>
    %192 = arith.addf %189, %191 : vector<8x128xf32>
    %cst_68 = arith.constant 1.702000e+00 : f32
    %193 = vector.broadcast %cst_68 : f32 to vector<8x128xf32>
    %194 = arith.mulf %193, %192 : vector<8x128xf32>
    %195 = arith.negf %194 : vector<8x128xf32>
    %196 = math.exp %195 : vector<8x128xf32>
    %cst_69 = arith.constant 1.000000e+00 : f32
    %197 = vector.broadcast %cst_69 : f32 to vector<8x128xf32>
    %198 = arith.addf %197, %196 : vector<8x128xf32>
    %199 = arith.divf %197, %198 : vector<8x128xf32>
    %200 = arith.mulf %192, %199 : vector<8x128xf32>
    %201 = arith.truncf %200 : vector<8x128xf32> to vector<8x128xbf16>
    %c0_70 = arith.constant 0 : index
    %c384_71 = arith.constant 384 : index
    %c0_72 = arith.constant 0 : index
    %202 = vector.load %arg7[%c0_70, %c384_71, %c0_72] : memref<1x512x128xbf16, #tpu.memory_space<vmem>>, vector<1x128x128xbf16>
    %203 = vector.shape_cast %202 : vector<1x128x128xbf16> to vector<128x128xbf16>
    %cst_73 = arith.constant dense<0.000000e+00> : vector<8x128xf32>
    %204 = tpu.matmul %201, %203, %cst_73 {dimension_numbers = #tpu.dot_dimension_numbers<[1], [0], [0], [1], [0, 0, 1, 1], [], []>} : vector<8x128xbf16>, vector<128x128xbf16>, vector<8x128xf32> -> vector<8x128xf32>
    %205 = arith.addf %186, %204 : vector<8x128xf32>
    %206 = arith.addf %105, %205 : vector<8x128xf32>
    %207 = vector.extract_strided_slice %5 {offsets = [12, 0], sizes = [1, 128], strides = [1, 1]} : vector<16x128xf32> to vector<1x128xf32>
    %208 = vector.broadcast %207 : vector<1x128xf32> to vector<8x128xf32>
    %209 = arith.addf %206, %208 : vector<8x128xf32>
    %c0_74 = arith.constant 0 : index
    %c0_75 = arith.constant 0 : index
    %210 = vector.load %arg9[%c0_74, %c0_75] : memref<8x128xf32, #tpu.memory_space<vmem>>, vector<8x128xf32>
    tpu.vector_store %arg9[%c0_74, %c0_75], %209 {strides = array<i32>} : memref<8x128xf32, #tpu.memory_space<vmem>>, vector<8x128xf32>,
    %c1_i32 = arith.constant 1 : i32
    %211 = arith.cmpi eq, %arg1, %c1_i32 : i32
    %212 = arith.extui %211 : i1 to i32
    %c0_i32_76 = arith.constant 0 : i32
    %213 = arith.cmpi ne, %212, %c0_i32_76 : i32
    scf.if %213 {
      %c0_77 = arith.constant 0 : index
      %c0_78 = arith.constant 0 : index
      %c0_79 = arith.constant 0 : index
      %214 = vector.load %arg8[%c0_77, %c0_78, %c0_79] : memref<1x8x128xf32, #tpu.memory_space<vmem>>, vector<1x8x128xf32>
      %215 = vector.shape_cast %214 : vector<1x8x128xf32> to vector<8x128xf32>
      %216 = vector.shape_cast %209 : vector<8x128xf32> to vector<1x8x128xf32>
      tpu.vector_store %arg8[%c0_77, %c0_78, %c0_79], %216 {strides = array<i32>} : memref<1x8x128xf32, #tpu.memory_space<vmem>>, vector<1x8x128xf32>,
    } else {
    }
    return
  }
  func.func @transform_0(%arg0: i32, %arg1: i32) -> (i32, i32, i32) {
    %c0_i32 = arith.constant 0 : i32
    %c0_i32_0 = arith.constant 0 : i32
    %c0_i32_1 = arith.constant 0 : i32
    return %arg0, %c0_i32, %c0_i32_0 : i32, i32, i32
  }
  func.func @transform_1(%arg0: i32, %arg1: i32) -> (i32, i32, i32) {
    %c0_i32 = arith.constant 0 : i32
    %c0_i32_0 = arith.constant 0 : i32
    %c0_i32_1 = arith.constant 0 : i32
    return %arg1, %c0_i32, %c0_i32_0 : i32, i32, i32
  }
  func.func @transform_2(%arg0: i32, %arg1: i32) -> (i32, i32, i32) {
    %c0_i32 = arith.constant 0 : i32
    %c0_i32_0 = arith.constant 0 : i32
    %c0_i32_1 = arith.constant 0 : i32
    return %arg1, %c0_i32, %c0_i32_0 : i32, i32, i32
  }
  func.func @transform_3(%arg0: i32, %arg1: i32) -> (i32, i32, i32) {
    %c0_i32 = arith.constant 0 : i32
    %c0_i32_0 = arith.constant 0 : i32
    %c0_i32_1 = arith.constant 0 : i32
    return %arg1, %c0_i32, %c0_i32_0 : i32, i32, i32
  }
  func.func @transform_4(%arg0: i32, %arg1: i32) -> (i32, i32, i32) {
    %c0_i32 = arith.constant 0 : i32
    %c0_i32_0 = arith.constant 0 : i32
    %c0_i32_1 = arith.constant 0 : i32
    return %arg1, %c0_i32, %c0_i32_0 : i32, i32, i32
  }
  func.func @transform_5(%arg0: i32, %arg1: i32) -> (i32, i32, i32) {
    %c0_i32 = arith.constant 0 : i32
    %c0_i32_0 = arith.constant 0 : i32
    %c0_i32_1 = arith.constant 0 : i32
    return %arg1, %c0_i32, %c0_i32_0 : i32, i32, i32
  }
  func.func @transform_6(%arg0: i32, %arg1: i32) -> (i32, i32, i32) {
    %c0_i32 = arith.constant 0 : i32
    %c0_i32_0 = arith.constant 0 : i32
    %c0_i32_1 = arith.constant 0 : i32
    return %arg0, %c0_i32, %c0_i32_0 : i32, i32, i32
  }
}

</mosaic_0001>

<bundles_post_ra>
// kernel: tpu_custom_call.1
= control target key start
LH: loop header
LB: loop body
LE: loop exit
PB: predicated region body
PF: predicated region fallthrough
CT: control target
= control target key end

     0   :  { %s4109_s0 = inlined_call_operand.hbm [shape: f32[2,8,128], index: 0, kind: input, shape index: {}]   ;;  %s4110_s1 = inlined_call_operand.hbm [shape: f32[2,16,128], index: 1, kind: input, shape index: {}]   ;;  %s4111_s2 = inlined_call_operand.hbm [shape: bf16[2,128,384], index: 2, kind: input, shape index: {}]   ;;  %s4112_s3 = inlined_call_operand.hbm [shape: bf16[2,128,128], index: 3, kind: input, shape index: {}]   ;;  %s4113_s4 = inlined_call_operand.hbm [shape: bf16[2,128,512], index: 4, kind: input, shape index: {}]   ;;  %s4114_s5 = inlined_call_operand.hbm [shape: bf16[2,512,128], index: 5, kind: input, shape index: {}]   ;;  %s4115_s6 = inlined_call_operand.hbm [shape: f32[2,8,128], index: 6, kind: output, shape index: {}]  }
   0x1   :  { %4136 = sst [smem:[#allocation33_spill]] %s4110_s1 }
   0x2   :  { %4137 = sst [smem:[#allocation34_spill]] %s4112_s3 }
   0x3   :  { %4138 = sst [smem:[#allocation35_spill]] %s4115_s6 }
   0x4   :  { %11 = vsyncpa [#allocation5], 0 }
   0x5   :  { %13 = vsyncpa [#allocation5 + $0x1], 0 }
   0x6   :  { %14 = vsyncpa [#allocation8], 0 }
   0x7   :  { %16 = vsyncpa [#allocation8 + $0x1], 0 }
   0x8   :  { %17 = vsyncpa [#allocation11], 0 }
   0x9   :  { %19 = vsyncpa [#allocation11 + $0x1], 0 }
   0xa   :  { %20 = vsyncpa [#allocation14], 0 }
   0xb   :  { %22 = vsyncpa [#allocation14 + $0x1], 0 }
   0xc   :  { %23 = vsyncpa [#allocation6], 0 }
   0xd   :  { %25 = vsyncpa [#allocation6 + $0x1], 0  ;;  %s3342_s21 = smov 0   ;;  %s3344_s22 = smov 0  }
   0xe   :  { %s3346_s23 = smov 0   ;;  %s3348_s24 = smov 0  }
   0xf   :  { %s3350_s25 = smov 0   ;;  %s3352_s26 = smov 0  }
  0x10   :  { %s3354_s27 = smov 0   ;;  %s3356_s28 = smov 0  }
  0x11   :  { %s3358_s29 = smov 0   ;;  %s3360_s30 = smov 0  }
  0x12   :  { %s3362_s7 = smov 0  }
  0x13 LB: > { %4139 = sst [smem:[#allocation21_spill]] %s3250_s22  ;;  %p4118_p0 = scmp.eq.s32.totalorder %s3286_s7, 0  ;;  %s3286_s7 = sphi %s3362_s7, %s31_s7   ;;  %s3282_s30 = sphi %s3360_s30, %s4189_s30   ;;  %s3278_s29 = sphi %s3358_s29, %s4193_s29   ;;  %s3274_s28 = sphi %s3356_s28, %s4187_s28   ;;  %s3270_s27 = sphi %s3354_s27, %s4192_s27   ;;  %s3266_s26 = sphi %s3352_s26, %s4186_s26   ;;  %s3262_s25 = sphi %s3350_s25, %s4191_s25   ;;  %s3258_s24 = sphi %s3348_s24, %s4190_s24   ;;  %s3254_s23 = sphi %s3346_s23, %s4184_s23   ;;  %s3250_s22 = sphi %s3344_s22, %s4183_s22   ;;  %s3246_s21 = sphi %s3342_s21, %s4182_s21  }
  0x14   : > { %4140 = sst [smem:[#allocation22_spill]] %s3254_s23  ;;  %p83_p1 = scmp.ne.s32.totalorder %s3254_s23, %s3250_s22 }
  0x15   : > { %4141 = sst [smem:[#allocation23_spill]] %s3266_s26  ;;  %p4117_p2 = scmp.lt.s32.totalorder %s3286_s7, 4 }
  0x16   : > { %4142 = sst [smem:[#allocation24_spill]] %s3270_s27  ;;  %s4116_s9 = sand.u32 1, %s3286_s7  }
  0x17   : > { %4143 = sst [smem:[#allocation25_spill]] %s3274_s28  ;;  %p85_p3 = por %p83_p1, %p4118_p0 }
  0x18   : > { %4144 = sst [smem:[#allocation26_spill]] %s3282_s30  ;;  %s3406_s10 = sand.u32 1, %s3254_s23  }
  0x19   : > { %s2371_s11 = sshll.u32 %s3278_s29, 8  ;;  %s2240_s12 = sshll.u32 %s3406_s10, 4 }
  0x1a   : > { %s4145_s1 = sld [smem:[#allocation33_spill]]  ;;  %p3417_p4 = pnand %p4117_p2, %p85_p3 }
  0x1b   : > { %s265_s17 = scalar_lea.vmem [#allocation7], %s2240_s12  ;;  %s3426_s19 = scalar_lea.sflag [#allocation8], %s4116_s9 }
  0x1c   : > { %s4146_s16 = scalar_select %p3417_p4, 1, 0 }
  0x1d   : > { %s272_s18 = sshll.u32 %s265_s17, 4  ;;  %p3432_p7 = pneg %p3417_p4  ;;  %s3421_s18 = int_to_ptr.vmem [resolvable:$true] %s272_s18 }
  0x20   : > { %s3413_s15 = scalar_lea.hbm %s4145_s1, %s2371_s11  ;;  %s2977_s14 = scalar_lea.hbm %s4145_s1, 512 }
  0x21   : > { %s2972_s20 = scalar_lea.hbm %s3413_s15, 256  ;;  %p2978_p10 = scmp.lt.u32.totalorder %s3413_s15, %s4145_s1 }
  0x22   : > { %p2973_p6 = scmp.ne.s32.totalorder %s3413_s15, %s2972_s20  ;;  %p2979_p11 = scmp.lt.u32.totalorder %s2977_s14, %s2972_s20 }
  0x23   : > { %p2981_p13 = scmp.lt.u32.totalorder %s2972_s20, %s3413_s15 }
  0x24   : > { %p2975_p8 = pnand %p3432_p7, %p2973_p6  ;;  %p2980_p12 = por %p2979_p11, %p2978_p10 }
  0x26   : > { %p2976_p9 = pneg %p2975_p8  ;;  %p2982_p1 = por %p2981_p13, %p2980_p12 }
  0x28   : > { %p2983_p3 = pnand %p2982_p1, %p2976_p9 }
  0x2a   : > { %2986 = shalt.err (!%p2983_p3)
}
  0x2b   : > { %s2987_s9 = scalar_lea.vmem %s3421_s18, 256  ;;  %s3288_s13 = smov [#allocation7]  }
  0x2c   : > { %p2988_p6 = scmp.ne.s32.totalorder %s3421_s18, %s2987_s9  ;;  %s2992_s12 = sshll.u32 %s3288_s13, 4  ;;  %s2993_s12 = int_to_ptr.vmem [resolvable:$false] %s2992_s12 }
  0x2d   : > { %s2994_s8 = scalar_lea.vmem %s2993_s12, 512  ;;  %p2995_p0 = scmp.lt.s32.totalorder %s3421_s18, %s2993_s12 }
  0x2e   : > { %p2990_p8 = pnand %p2988_p6, %p3432_p7  ;;  %p2996_p5 = scmp.lt.s32.totalorder %s2994_s8, %s2987_s9 }
  0x30   : > { %p2991_p2 = pneg %p2990_p8  ;;  %p2997_p10 = por %p2996_p5, %p2995_p0 }
  0x32   : > { %p2998_p11 = pnand %p2997_p10, %p2991_p2 }
  0x34   : > { %3001 = shalt.err (!%p2998_p11)
}
  0x35   : > { %s3289_s20 = smov 128   ;;  %s3290_s14 = smov 8  }
  0x36   : > { %2721 = dma.hbm_to_vmem [thread:$0]  (!%p3417_p4), %s3413_s15, 256, %s3421_s18, %s3426_s19, %s3289_s20, %s3289_s20, %s3290_s14  }
  0x37   : > { %p364_p9 = scmp.lt.s32.totalorder %s3286_s7, 5  ;;  %s2244_s17 = sshll.u32 %s3406_s10, 6 }
  0x38   : > { %s2372_s9 = sshll.u32 %s3278_s29, 10  ;;  %p4148_p0 = scmp.ge.s32.totalorder %s3286_s7, 1 }
  0x39   : > { %s4150_s3 = sld [smem:[#allocation34_spill]]  ;;  %s307_s6 = scalar_lea.vmem [#allocation10], %s2244_s17 }
  0x3a   : > { %p3461_p2 = pnand %p4148_p0, %p364_p9  ;;  %s314_s28 = sshll.u32 %s307_s6, 4  ;;  %s3470_s28 = int_to_ptr.vmem [resolvable:$true] %s314_s28 }
  0x3b   : > { %s4151_s15 = sand.u32 1, %s3286_s7  }
  0x3c   : > { %s4149_s13 = scalar_select %p3461_p2, 1, 0 }
  0x3d   : > { %s3474_s18 = scalar_lea.sflag [#allocation11], %s4151_s15 }
  0x3f   : > { %s3468_s1 = scalar_lea.hbm %s4150_s3, %s2372_s9  ;;  %s3007_s9 = scalar_lea.hbm %s4150_s3, 2048 }
  0x40   : > { %s3002_s20 = scalar_lea.hbm %s3468_s1, 1024  ;;  %p3008_p1 = scmp.lt.u32.totalorder %s3468_s1, %s4150_s3 }
  0x41   : > { %p3003_p5 = scmp.ne.s32.totalorder %s3468_s1, %s3002_s20  ;;  %p3009_p3 = scmp.lt.u32.totalorder %s3007_s9, %s3002_s20 }
  0x42   : > { %p3011_p8 = scmp.lt.u32.totalorder %s3002_s20, %s3468_s1 }
  0x43   : > { %p3005_p12 = pnand %p3003_p5, %p3432_p7  ;;  %p3010_p6 = por %p3009_p3, %p3008_p1 }
  0x45   : > { %p3006_p13 = pneg %p3005_p12  ;;  %p3012_p10 = por %p3011_p8, %p3010_p6 }
  0x47   : > { %p3013_p11 = pnand %p3012_p10, %p3006_p13 }
  0x49   : > { %3016 = shalt.err (!%p3013_p11)
}
  0x4a   : > { %s3017_s6 = scalar_lea.vmem %s3470_s28, 1024  ;;  %s3291_s17 = smov [#allocation10]  }
  0x4b   : > { %p3018_p9 = scmp.ne.s32.totalorder %s3470_s28, %s3017_s6  ;;  %s3022_s15 = sshll.u32 %s3291_s17, 4  ;;  %s3023_s15 = int_to_ptr.vmem [resolvable:$false] %s3022_s15 }
  0x4c   : > { %s3024_s27 = scalar_lea.vmem %s3023_s15, 2048  ;;  %p3025_p12 = scmp.lt.s32.totalorder %s3470_s28, %s3023_s15 }
  0x4d   : > { %p3020_p0 = pnand %p3018_p9, %p3432_p7  ;;  %p3026_p2 = scmp.lt.s32.totalorder %s3024_s27, %s3017_s6 }
  0x4f   : > { %p3021_p5 = pneg %p3020_p0  ;;  %p3027_p1 = por %p3026_p2, %p3025_p12 }
  0x51   : > { %p3028_p3 = pnand %p3027_p1, %p3021_p5 }
  0x53   : > { %3031 = shalt.err (!%p3028_p3)
}
  0x54   : > { %s4120_s20 = smov 64   ;;  %s4121_s14 = smov 4  }
  0x55   : > { %2727 = dma.hbm_to_vmem [thread:$0]  (!%p3417_p4), %s3468_s1, 1024, %s3470_s28, %s3474_s18, %s4120_s20, %s4120_s20, %s4121_s14  }
  0x56   : > { %s3502_s12 = sadd.s32 4294967295, %s3286_s7   ;;  %s2235_s9 = sadd.s32 4294967294, %s3286_s7  }
  0x57   : > { %4152 = sst [smem:[#allocation27_spill]] %s3502_s12  ;;  %s40_s8 = sadd.s32 1, %s3278_s29 }
  0x58   : > { %p41_p2 = scmp.ge.s32.totalorder %s40_s8, 2  ;;  %s43_s6 = sadd.s32 1, %s3282_s30 }
  0x59   : > { %s50_s17 = sadd.s32 1, %s3266_s26  ;;  %p57_p13 = scmp.ne.s32.totalorder %s3266_s26, %s3262_s25 }
  0x5a   : > { %s4195_s8 = smov (%p41_p2, %s40_s8), 0  ;;  %s4197_s6 = smov (!%p41_p2, %s43_s6), %s3282_s30 }
  0x5b   : > { %4153 = sst [smem:[#allocation28_spill]] %s4195_s8  ;;  %p4154_p6 = scmp.eq.s32.totalorder %s3286_s7, 0 }
  0x5c   : > { %p63_p10 = scmp.ne.s32.totalorder %s3262_s25, %s3258_s24  ;;  %p45_p11 = scmp.ge.s32.totalorder %s4197_s6, 2 }
  0x5d   : > { %p3518_p8 = por %p4154_p6, %p57_p13  ;;  %p64_p9 = scmp.eq.s32.totalorder %s3502_s12, 0 }
  0x5e   : > { %s73_s28 = ssub.s32 %s3278_s29, %s4195_s8  ;;  %p89_p0 = scmp.ne.s32.totalorder %s3250_s22, %s3246_s21 }
  0x5f   : > { %s4199_s6 = smov (%p45_p11, %s4197_s6), 0  ;;  %p3534_p5 = por %p64_p9, %p63_p10 }
  0x60   : > { %4156 = sst [smem:[#allocation29_spill]] %s4199_s6  ;;  %p74_p12 = scmp.eq.s32.totalorder %s73_s28, 0 }
  0x61   : > { %s4157_s15 = scalar_select %p3534_p5, 1, 0 }
  0x62   : > { %s47_s27 = ssub.s32 %s3282_s30, %s4199_s6  ;;  %p3540_p1 = por %p89_p0, %p64_p9 }
  0x63   : > { %p48_p3 = scmp.eq.s32.totalorder %s47_s27, 0  ;;  %p217_p2 = scmp.eq.s32.totalorder %s3502_s12, 3 }
  0x64   : > { %s4158_s20 = scalar_select %p3540_p1, 1, 0 }
  0x65   : > { %s4160_s21 = sadd.s32 1, %s3254_s23  ;;  %p3556_p6 = por %p217_p2, %p57_p13 }
  0x66   : > { %4159 = sst [smem:[#allocation30_spill]] %s4158_s20  ;;  %p223_p11 = scmp.eq.s32.totalorder %s2235_s9, 3 }
  0x67   : > { %s3548_s14 = scalar_select %p74_p12, %s3254_s23, %s4160_s21  }
  0x68   : > { %s3551_s3 = scalar_select %p48_p3, %s3266_s26, %s50_s17  }
  0x69   : > { %4161 = sst [smem:[#allocation31_spill]] %s3548_s14  ;;  %s243_s28 = sand.u32 1, %s3266_s26  }
  0x6a   : > { %4162 = sst [smem:[#allocation32_spill]] %s3551_s3  ;;  %s2239_s6 = sshll.u32 %s3282_s30, 7 }
  0x6b   : > { %s4163_s8 = scalar_select %p3556_p6, 1, 0 }
  0x6c   : > { %p3565_p9 = por %p223_p11, %p63_p10  ;;  %s2238_s27 = sshll.u32 %s243_s28, 3 }
  0x6d   : > { %s3572_s21 = scalar_lea.hbm %s4109_s0, %s2239_s6  ;;  %p4165_p0 = scmp.lt.s32.totalorder %s3286_s7, 4 }
  0x6e   : > { %s4164_s22 = scalar_select %p3565_p9, 1, 0 }
  0x6f   : > { %p3578_p13 = pnand %p4165_p0, %p3518_p8  ;;  %s247_s17 = scalar_lea.vmem [#allocation4], %s2238_s27 }
  0x70   : > { %s254_s30 = sshll.u32 %s247_s17, 4  ;;  %s2698_s3 = smul.u32 192, %s3406_s10  ;;  %s3583_s30 = int_to_ptr.vmem [resolvable:$true] %s254_s30 }
  0x71   : > { %s244_s20 = scalar_lea.sflag [#allocation5], %s243_s28  ;;  %s3032_s12 = scalar_lea.hbm %s3572_s21, 128 }
  0x72   : > { %p3033_p10 = scmp.ne.s32.totalorder %s3572_s21, %s3032_s12  ;;  %p3034_p12 = pneg %p3578_p13 }
  0x73   : > { %s3037_s26 = scalar_lea.hbm %s4109_s0, 256  ;;  %p3038_p8 = scmp.lt.u32.totalorder %s3572_s21, %s4109_s0 }
  0x74   : > { %p3035_p3 = pnand %p3034_p12, %p3033_p10  ;;  %p3039_p11 = scmp.lt.u32.totalorder %s3037_s26, %s3032_s12 }
  0x75   : > { %p3041_p9 = scmp.lt.u32.totalorder %s3032_s12, %s3572_s21 }
  0x76   : > { %p3036_p2 = pneg %p3035_p3  ;;  %p3040_p0 = por %p3039_p11, %p3038_p8 }
  0x78   : > { %p3042_p6 = por %p3041_p9, %p3040_p0 }
  0x7a   : > { %p3043_p1 = pnand %p3042_p6, %p3036_p2 }
  0x7c   : > { %3046 = shalt.err (!%p3043_p1)
}
  0x7d   : > { %s3047_s28 = scalar_lea.vmem %s3583_s30, 128  ;;  %s3294_s27 = smov [#allocation4]  }
  0x7e   : > { %p3048_p10 = scmp.ne.s32.totalorder %s3583_s30, %s3047_s28  ;;  %s3052_s17 = sshll.u32 %s3294_s27, 4  ;;  %s3053_s17 = int_to_ptr.vmem [resolvable:$false] %s3052_s17 }
  0x7f   : > { %s3054_s23 = scalar_lea.vmem %s3053_s17, 256  ;;  %p3055_p4 = scmp.lt.s32.totalorder %s3583_s30, %s3053_s17 }
  0x80   : > { %p3050_p3 = pnand %p3048_p10, %p3034_p12  ;;  %p3056_p8 = scmp.lt.s32.totalorder %s3054_s23, %s3047_s28 }
  0x82   : > { %p3051_p5 = pneg %p3050_p3  ;;  %p3057_p11 = por %p3056_p8, %p3055_p4 }
  0x84   : > { %p3058_p9 = pnand %p3057_p11, %p3051_p5 }
  0x86   : > { %3061 = shalt.err (!%p3058_p9)
}
  0x87   : > { %2718 = dma.hbm_to_vmem [thread:$0]  (!%p3578_p13), %s3572_s21, 128, %s3583_s30, %s244_s20  }
  0x88   : > { %s2699_s26 = smul.u32 3072, %s3278_s29  ;;  %s286_s14 = scalar_lea.vmem [#allocation9], %s2698_s3 }
  0x89   : > { %s293_s12 = sshll.u32 %s286_s14, 4  ;;  %s2247_s9 = sshll.u32 %s3406_s10, 8  ;;  %s3618_s12 = int_to_ptr.vmem [resolvable:$true] %s293_s12 }
  0x8a   : > { %s3616_s28 = scalar_lea.hbm %s4111_s2, %s2699_s26  ;;  %s3067_s21 = scalar_lea.hbm %s4111_s2, 6144 }
  0x8b   : > { %s3062_s27 = scalar_lea.hbm %s3616_s28, 3072  ;;  %p3068_p6 = scmp.lt.u32.totalorder %s3616_s28, %s4111_s2 }
  0x8c   : > { %p3063_p4 = scmp.ne.s32.totalorder %s3616_s28, %s3062_s27  ;;  %p3069_p13 = scmp.lt.u32.totalorder %s3067_s21, %s3062_s27 }
  0x8d   : > { %p3071_p2 = scmp.lt.u32.totalorder %s3062_s27, %s3616_s28 }
  0x8e   : > { %p3065_p5 = pnand %p3063_p4, %p3432_p7  ;;  %p3070_p12 = por %p3069_p13, %p3068_p6 }
  0x90   : > { %p3066_p1 = pneg %p3065_p5  ;;  %p3072_p0 = por %p3071_p2, %p3070_p12 }
  0x92   : > { %p3073_p10 = pnand %p3072_p0, %p3066_p1 }
  0x94   : > { %3076 = shalt.err (!%p3073_p10)
}
  0x95   : > { %s3077_s23 = scalar_lea.vmem %s3618_s12, 3072  ;;  %s3295_s26 = smov [#allocation9]  }
  0x96   : > { %p3078_p3 = scmp.ne.s32.totalorder %s3618_s12, %s3077_s23  ;;  %s3082_s14 = sshll.u32 %s3295_s26, 4  ;;  %s3083_s14 = int_to_ptr.vmem [resolvable:$false] %s3082_s14 }
  0x97   : > { %s3084_s6 = scalar_lea.vmem %s3083_s14, 6144  ;;  %p3085_p9 = scmp.lt.s32.totalorder %s3618_s12, %s3083_s14 }
  0x98   : > { %p3080_p8 = pnand %p3078_p3, %p3432_p7  ;;  %p3086_p4 = scmp.lt.s32.totalorder %s3084_s6, %s3077_s23 }
  0x9a   : > { %p3081_p11 = pneg %p3080_p8  ;;  %p3087_p5 = por %p3086_p4, %p3085_p9 }
  0x9c   : > { %p3088_p6 = pnand %p3087_p5, %p3081_p11 }
  0x9e   : > { %3091 = shalt.err (!%p3088_p6)
}
  0x9f   : > { %s3296_s1 = smov 192   ;;  %s3297_s27 = smov 12  }
  0xa0   : > { %p4167_p1 = scmp.ne.s32.totalorder %s4146_s16, 0  ;;  %s2373_s30 = sshll.u32 %s3278_s29, 12 }
  0xa1   : > { %s3649_s20 = scalar_lea.hbm %s4113_s4, %s2373_s30  ;;  %s328_s17 = scalar_lea.vmem [#allocation12], %s2247_s9 }
  0xa2   : > { %2724 = dma.hbm_to_vmem [thread:$0]  (!%p4167_p1), %s3616_s28, 3072, %s3618_s12, %s3426_s19, %s3296_s1, %s3296_s1, %s3297_s27  }
  0xa3   : > { %s335_s23 = sshll.u32 %s328_s17, 4  ;;  %s3092_s26 = scalar_lea.hbm %s3649_s20, 4096  ;;  %s3653_s23 = int_to_ptr.vmem [resolvable:$true] %s335_s23 }
  0xa4   : > { %p3093_p13 = scmp.ne.s32.totalorder %s3649_s20, %s3092_s26  ;;  %s3097_s28 = scalar_lea.hbm %s4113_s4, 8192 }
  0xa5   : > { %p3098_p0 = scmp.lt.u32.totalorder %s3649_s20, %s4113_s4  ;;  %p3099_p10 = scmp.lt.u32.totalorder %s3097_s28, %s3092_s26 }
  0xa6   : > { %p3095_p12 = pnand %p3093_p13, %p3432_p7  ;;  %p3101_p8 = scmp.lt.u32.totalorder %s3092_s26, %s3649_s20 }
  0xa7   : > { %p3100_p3 = por %p3099_p10, %p3098_p0 }
  0xa8   : > { %p3096_p2 = pneg %p3095_p12 }
  0xa9   : > { %p3102_p11 = por %p3101_p8, %p3100_p3 }
  0xab   : > { %p3103_p9 = pnand %p3102_p11, %p3096_p2 }
  0xad   : > { %3106 = shalt.err (!%p3103_p9)
}
  0xae   : > { %s3107_s1 = scalar_lea.vmem %s3653_s23, 4096  ;;  %s3298_s27 = smov [#allocation12]  }
  0xaf   : > { %p3108_p4 = scmp.ne.s32.totalorder %s3653_s23, %s3107_s1  ;;  %s3112_s3 = sshll.u32 %s3298_s27, 4  ;;  %s3113_s3 = int_to_ptr.vmem [resolvable:$false] %s3112_s3 }
  0xb0   : > { %s3114_s21 = scalar_lea.vmem %s3113_s3, 8192  ;;  %p3115_p13 = scmp.lt.s32.totalorder %s3653_s23, %s3113_s3 }
  0xb1   : > { %p3110_p5 = pnand %p3108_p4, %p3432_p7  ;;  %p3116_p12 = scmp.lt.s32.totalorder %s3114_s21, %s3107_s1 }
  0xb3   : > { %p3111_p6 = pneg %p3110_p5  ;;  %p3117_p0 = por %p3116_p12, %p3115_p13 }
  0xb5   : > { %p3118_p10 = pnand %p3117_p0, %p3111_p6 }
  0xb7   : > { %3121 = shalt.err (!%p3118_p10)
}
  0xb8   : > { %s3299_s17 = smov 256   ;;  %s3300_s26 = smov 16  }
  0xb9   : > { %2730 = dma.hbm_to_vmem [thread:$0]  (!%p4167_p1), %s3649_s20, 4096, %s3653_s23, %s3474_s18, %s3299_s17, %s3299_s17, %s3300_s26  }
  0xba   : > { %s3682_s28 = scalar_lea.hbm %s4114_s5, %s2373_s30  ;;  %s349_s14 = scalar_lea.vmem [#allocation13], %s2247_s9 }
  0xbb   : > { %s356_s6 = sshll.u32 %s349_s14, 4  ;;  %s346_s1 = scalar_lea.sflag [#allocation14], %s3406_s10  ;;  %s3686_s6 = int_to_ptr.vmem [resolvable:$true] %s356_s6 }
  0xbc   : > { %s3122_s27 = scalar_lea.hbm %s3682_s28, 4096  ;;  %s3127_s30 = scalar_lea.hbm %s4114_s5, 8192 }
  0xbd   : > { %p3123_p2 = scmp.ne.s32.totalorder %s3682_s28, %s3122_s27  ;;  %p3128_p11 = scmp.lt.u32.totalorder %s3682_s28, %s4114_s5 }
  0xbe   : > { %p3129_p9 = scmp.lt.u32.totalorder %s3127_s30, %s3122_s27  ;;  %p3131_p5 = scmp.lt.u32.totalorder %s3122_s27, %s3682_s28 }
  0xbf   : > { %p3125_p3 = pnand %p3123_p2, %p3432_p7 }
  0xc0   : > { %p3130_p4 = por %p3129_p9, %p3128_p11 }
  0xc1   : > { %p3126_p8 = pneg %p3125_p3 }
  0xc2   : > { %p3132_p6 = por %p3131_p5, %p3130_p4 }
  0xc4   : > { %p3133_p13 = pnand %p3132_p6, %p3126_p8 }
  0xc6   : > { %3136 = shalt.err (!%p3133_p13)
}
  0xc7   : > { %s3137_s9 = scalar_lea.vmem %s3686_s6, 4096  ;;  %s3301_s21 = smov [#allocation13]  }
  0xc8   : > { %p3138_p12 = scmp.ne.s32.totalorder %s3686_s6, %s3137_s9  ;;  %s3142_s17 = sshll.u32 %s3301_s21, 4  ;;  %s3143_s17 = int_to_ptr.vmem [resolvable:$false] %s3142_s17 }
  0xc9   : > { %s3144_s26 = scalar_lea.vmem %s3143_s17, 8192  ;;  %p3145_p2 = scmp.lt.s32.totalorder %s3686_s6, %s3143_s17 }
  0xca   : > { %p3140_p0 = pnand %p3138_p12, %p3432_p7  ;;  %p3146_p3 = scmp.lt.s32.totalorder %s3144_s26, %s3137_s9 }
  0xcc   : > { %p3141_p10 = pneg %p3140_p0  ;;  %p3147_p11 = por %p3146_p3, %p3145_p2 }
  0xce   : > { %p3148_p9 = pnand %p3147_p11, %p3141_p10 }
  0xd0   : > { %3151 = shalt.err (!%p3148_p9)
}
  0xd1   : > { %s4168_s19 = smov 4   ;;  %s4169_s12 = smov 64  }
  0xd2   : > { %2733 = dma.hbm_to_vmem [thread:$0]  (!%p4167_p1), %s3682_s28, 4096, %s3686_s6, %s346_s1, %s4169_s12, %s4169_s12, %s4168_s19  }
  0xd3   : > { %p4170_p7 = scmp.ne.s32.totalorder %s4149_s13, 0 }
  0xd4   : > { %s3718_s11 = sand.u32 (!%p4170_p7), 1, %s3262_s25   ;;  %p4171_p8 = scmp.ne.s32.totalorder (!%p4170_p7), %s4157_s15, 0 }
  0xd5   : > { %368 = sbr.rel (%p4170_p7) target bundleno = 3220 (0xc94), region = 44  ;;  %s2254_s14 = sshll.u32 (!%p4170_p7), %s3718_s11, 3 }
  0xd6   : > { %s371_s27 = scalar_lea.sflag (!%p4170_p7), [#allocation5], %s3718_s11  ;;  %s374_s16 = scalar_lea.vmem (!%p4170_p7), [#allocation4], %s2254_s14 }
  0xdc   : > { %3225 = dma.done.wait (%p4171_p8), %s371_s27, 128  }
  0xdd   : > { %3227 = vsyncadd (%p4171_p8), %s371_s27, 4294967168  ;;  %s4172_s10 = sld [smem:[#allocation27_spill]]  ;;  %s4173_s18 = sld [smem:[#allocation21_spill]] }
  0xde   : > { %s4174_s28 = sld [smem:[#allocation30_spill]] }
  0xe3   : > { %s379_s6 = sand.u32 1, %s4172_s10   ;;  %s381_s13 = sand.u32 1, %s4173_s18  }
  0xe4   : > { %s2255_s1 = sshll.u32 %s381_s13, 4  ;;  %s380_s20 = scalar_lea.sflag [#allocation8], %s379_s6 }
  0xe5   : > { %s3728_s30 = scalar_lea.vmem [#allocation7], %s2255_s1  ;;  %p4175_p1 = scmp.ne.s32.totalorder %s4174_s28, 0 }
  0xe7   : > { %3229 = dma.done.wait (%p4175_p1), %s380_s20, 3328  }
  0xe8   : > { %3231 = vsyncadd (%p4175_p1), %s380_s20, 4294963968  ;;  %s2700_s23 = smul.u32 192, %s381_s13  ;;  %s2256_s3 = sshll.u32 %s381_s13, 6 }
  0xe9   : > { %s398_s15 = scalar_lea.sflag [#allocation11], %s379_s6  ;;  %s3736_s21 = scalar_lea.vmem [#allocation10], %s2256_s3 }
  0xea   : > { %s3734_s9 = scalar_lea.vmem [#allocation9], %s2700_s23 }
  0xeb   : > { %3233 = dma.done.wait (%p4175_p1), %s398_s15, 5120  }
  0xec   : > { %3235 = vsyncadd (%p4175_p1), %s398_s15, 4294962176  ;;  %s2257_s17 = sshll.u32 %s381_s13, 8  ;;  %s416_s19 = scalar_lea.sflag [#allocation14], %s381_s13 }
  0xed   : > { %s3742_s26 = scalar_lea.vmem [#allocation12], %s2257_s17  ;;  %s3744_s12 = scalar_lea.vmem [#allocation13], %s2257_s17 }
  0xee   : > { %3237 = dma.done.wait (%p4175_p1), %s416_s19, 4096  }
  0xef   : > { %3239 = vsyncadd (%p4175_p1), %s416_s19, 4294963200  ;;  %s3750_s27 = scalar_lea.vmem [#allocation15], %s2254_s14  ;;  %s4176_s10 = sld [smem:[#allocation24_spill]] }
  0xf5   : > { %p2260_p4 = scmp.ne.s32.totalorder %s4176_s10, 0 }
  0xf6   : > { %v478_v0 = vld [vmem:[%s374_s16] sm:$0xff] (!%p2260_p4) }
  0xf7   : > { %477 = sbr.rel (%p2260_p4) target bundleno = 254 (0xfe), region = 72  ;;  %479 = vst [vmem:[#allocation2] sm:$0xff] (!%p2260_p4), %v478_v0 }
  0xfe PF: > { %v3753_v1 = vld [vmem:[#allocation2] sm:$0xff]  ;;  %v2842_v3 = vld [vmem:[%s3734_s9] ss:$12 sps:$4 sm:$0xff]   ;;  %v3302_v4 = vmov 0.0   ;;  %v2850_v14 = vld [vmem:[%s3734_s9 + $0x30] ss:$12 sps:$4 sm:$0xff]   ;;  %v495_v34 = vlaneseq }
  0xff   : > { %483 = vadd.xlane.f32.xlu0 %v3753_v1  ;;  %v2840_v2 = vld [vmem:[%s3734_s9 + $0x4] ss:$12 sps:$4 sm:$0xff]   ;;  %2474 = vmatprep.subr.bf16.mxu1 %v3302_v4  ;;  %v2843_v5 = vld [vmem:[%s3734_s9 + $0x8] ss:$12 sps:$4 sm:$0xff]   ;;  %v2847_v8 = vld [vmem:[%s3734_s9 + $0x20] ss:$12 sps:$4 sm:$0xff]  }
 0x100   : > { %v2844_v6 = vld [vmem:[%s3734_s9 + $0x1c] ss:$12 sps:$4 sm:$0xff]   ;;  %v2846_v7 = vld [vmem:[%s3734_s9 + $0x18] ss:$12 sps:$4 sm:$0xff]   ;;  %666 = vmatprep.subr.bf16.mxu0 %v2840_v2  ;;  %v2848_v9 = vld [vmem:[%s3734_s9 + $0x34] ss:$12 sps:$4 sm:$0xff]   ;;  %2475 = vmatpush3.bf16.msra.mxu1 %v2843_v5 }
 0x101   : > { %667 = vmatpush1.bf16.msra.mxu0 %v2842_v3  ;;  %2476 = vmatprep.subr.bf16.mxu1 %v3302_v4  ;;  %v2851_v15 = vld [vmem:[%s3734_s9 + $0x38] ss:$12 sps:$4 sm:$0xff]   ;;  %v2854_v17 = vld [vmem:[%s3734_s9 + $0x48] ss:$12 sps:$4 sm:$0xff]   ;;  %v2855_v18 = vld [vmem:[%s3734_s9 + $0x50] ss:$12 sps:$4 sm:$0xff]  }
 0x102   : > { %668 = vmatprep.subr.bf16.mxu0 %v2844_v6  ;;  %v2852_v16 = vld [vmem:[%s3734_s9 + $0x4c] ss:$12 sps:$4 sm:$0xff]   ;;  %v2856_v19 = vld [vmem:[%s3734_s9 + $0x64] ss:$12 sps:$4 sm:$0xff]   ;;  %v2859_v21 = vld [vmem:[%s3734_s9 + $0x68] ss:$12 sps:$4 sm:$0xff]  }
 0x103   : > { %v2858_v20 = vld [vmem:[%s3734_s9 + $0x60] ss:$12 sps:$4 sm:$0xff]   ;;  %v2860_v22 = vld [vmem:[%s3734_s9 + $0x7c] ss:$12 sps:$4 sm:$0xff]   ;;  %v2862_v23 = vld [vmem:[%s3734_s9 + $0x78] ss:$12 sps:$4 sm:$0xff]  }
 0x104   : > { %2477 = vmatpush3.bf16.msra.mxu1 %v2847_v8  ;;  %v2863_v24 = vld [vmem:[%s3734_s9 + $0x80] ss:$12 sps:$4 sm:$0xff]   ;;  %v3303_v26 = vmov 0   ;;  %vm3304_vm0 = vmmov 0   ;;  %v2866_v27 = vld [vmem:[%s3734_s9 + $0x90] ss:$12 sps:$4 sm:$0xff]  }
 0x105   : > { %669 = vmatpush1.bf16.msra.mxu0 %v2846_v7  ;;  %2478 = vmatprep.subr.bf16.mxu1 %v3302_v4  ;;  %v2864_v25 = vld [vmem:[%s3734_s9 + $0x94] ss:$12 sps:$4 sm:$0xff]   ;;  %v2867_v28 = vld [vmem:[%s3734_s9 + $0x98] ss:$12 sps:$4 sm:$0xff]   ;;  %v2871_v31 = vld [vmem:[%s3734_s9 + $0xb0] ss:$12 sps:$4 sm:$0xff]  }
 0x106   : > { %670 = vmatprep.subr.bf16.mxu0 %v2848_v9  ;;  %698 = vmatprep.mubr.bf16.mxu0 %v3303_v26  ;;  %v2868_v29 = vld [vmem:[%s3734_s9 + $0xac] ss:$12 sps:$4 sm:$0xff]   ;;  %v2870_v30 = vld [vmem:[%s3734_s9 + $0xa8] ss:$12 sps:$4 sm:$0xff]   ;;  %v3793_v36 = vshrl.u32 %v495_v34, 7  ;;  %vm765_vm1 = vcmask 523264  }
 0x107   : > { %2490 = vmatprep.mubr.msk.bf16.mxu1 %vm3304_vm0, %v3302_v4  ;;  %v3797_v38 = vld [vmem:[%s3728_s30] sm:$0xff]  ;;  %s3305_s14 = smov 64   ;;  %vm827_vm2 = vcmask 1043456   ;;  %vm813_vm3 = vcmask 64512   ;;  %vm874_vm4 = vcmask 519168   ;;  %vm997_vm5 = vcmask 1043968  }
 0x108   : > { %2479 = vmatpush3.bf16.msra.mxu1 %v2851_v15  ;;  %v497_v37 = vsub.s32 0, %v3793_v36  ;;  %v502_v39 = vsub.s32 1, %v3793_v36  ;;  %v749_v47 = vsub.s32 2, %v3793_v36  ;;  %v755_v48 = vsub.s32 3, %v3793_v36  ;;  %s4177_s16 = sld [smem:[#allocation24_spill]] }
 0x109   : > { %671 = vmatpush1.bf16.msra.mxu0 %v2850_v14  ;;  %2480 = vmatprep.subr.bf16.mxu1 %v3302_v4  ;;  %v761_v49 = vsub.s32 4, %v3793_v36 }
 0x10a   : > { %672 = vmatprep.subr.bf16.mxu0 %v2852_v16  ;;  %v498_v40 = vrot.slane %v3797_v38, %v497_v37  ;;  %v503_v43 = vrot.slane %v3797_v38, %v502_v39  ;;  %v750_v50 = vrot.slane %v3797_v38, %v749_v47  ;;  %v756_v51 = vrot.slane %v3797_v38, %v755_v48 }
 0x10b   : > { %v762_v52 = vrot.slane %v3797_v38, %v761_v49 }
 0x10c   : > { %2481 = vmatpush3.bf16.msra.mxu1 %v2855_v18 }
 0x10d   : > { %673 = vmatpush1.bf16.msra.mxu0 %v2854_v17  ;;  %2482 = vmatprep.subr.bf16.mxu1 %v3302_v4 }
 0x10e   : > { %674 = vmatprep.subr.bf16.mxu0 %v2856_v19  ;;  %p2366_p5 = scmp.ne.s32.totalorder %s4177_s16, 1 }
 0x110   : > { %2483 = vmatpush3.bf16.msra.mxu1 %v2859_v21 }
 0x111   : > { %675 = vmatpush1.bf16.msra.mxu0 %v2858_v20  ;;  %2484 = vmatprep.subr.bf16.mxu1 %v3302_v4 }
 0x112   : > { %676 = vmatprep.subr.bf16.mxu0 %v2860_v22 }
 0x114   : > { %2485 = vmatpush3.bf16.msra.mxu1 %v2863_v24 }
 0x115   : > { %677 = vmatpush1.bf16.msra.mxu0 %v2862_v23  ;;  %2486 = vmatprep.subr.bf16.mxu1 %v3302_v4 }
 0x116   : > { %678 = vmatprep.subr.bf16.mxu0 %v2864_v25 }
 0x118   : > { %2487 = vmatpush3.bf16.msra.mxu1 %v2867_v28 }
 0x119   : > { %679 = vmatpush1.bf16.msra.mxu0 %v2866_v27  ;;  %2488 = vmatprep.subr.bf16.mxu1 %v3302_v4 }
 0x11a   : > { %680 = vmatprep.subr.bf16.mxu0 %v2868_v29 }
 0x11c   : > { %2489 = vmatpush3.bf16.msra.mxu1 %v2871_v31 }
 0x11d   : > { %681 = vmatpush1.bf16.msra.mxu0 %v2870_v30  ;;  %2494 = vmatprep.subr.bf16.mxu1 %v3302_v4 }
 0x11e   : > { %2518 = vmatprep.subr.bf16.mxu0 %v3302_v4 }
 0x18c   : > { %v484_v10 = vpop.xlane.xlu0 %483 }
 0x18d   : > { %v486_v11 = vmul.f32 0.0078125, %v484_v10 }
 0x18f   : > { %v487_v12 = vsub.f32 %v3753_v1, %v486_v11 }
 0x191   : > { %v488_v13 = vmul.f32 %v487_v12, %v487_v12 }
 0x193   : > { %489 = vadd.xlane.f32.xlu0 %v488_v13 }
 0x220   : > { %v490_v32 = vpop.xlane.xlu0 %489 }
 0x221   : > { %v491_v33 = vmul.f32 0.0078125, %v490_v32 }
 0x223   : > { %v492_v35 = vadd.f32 1e-05, %v491_v33 }
 0x225   : > { %2944 = vrsqrt.f32 %v492_v35 }
 0x22f   : > { %v2945_v41 = vpop.eup %2944 }
 0x230   : > { %v494_v42 = vmul.f32 %v2945_v41, %v487_v12 }
 0x232   : > { %v499_v44 = vmul.f32 %v498_v40, %v494_v42 }
 0x234   : > { %v504_v45 = vadd.f32 %v503_v43, %v499_v44 }
 0x236   : > { %v505_v46 = vpack.c.bf16 %v504_v45, %v504_v45 }
 0x238   : > { %699 = vmatmul.mubr.bf16.vlgmr.msra.gmra.mrb[0].mxu0 %v505_v46  ;;  %2491 = vmatmul.mubr.bf16.vlgmr.msra.gmra.mrb[0].mxu1 %v505_v46 }
 0x239   : > { %2496 = vmatprep.mubr.msk.bf16.mxu1 %vm3304_vm0, %v3302_v4  ;;  %2534 = vmatprep.mubr.msk.bf16.mxu0 %vm3304_vm0, %v3302_v4 }
 0x30b   : > { %v700_v53 = vpop.f32.mrb[0].mxu0  ;;  %v741_v54 = vpop.f32.mrb[0].mxu1 }
 0x30c   : > { %v751_v55 = vadd.f32 %v750_v50, %v700_v53  ;;  %v702_v56 = vpop.f32.mrb[1].mxu0  ;;  %v2492_v57 = vpop.f32.mrb[1].mxu1  ;;  %v763_v62 = vadd.f32 %v762_v52, %v741_v54  ;;  %v2873_v52 = vld [vmem:[%s3736_s21 + $0x8] sm:$0xff]   ;;  %v2874_v53 = vld [vmem:[%s3736_s21 + $0x10] sm:$0xff]   ;;  %v2875_v54 = vld [vmem:[%s3736_s21 + $0x18] sm:$0xff]  }
 0x30d   : > { %v757_v58 = vadd.f32 %v756_v51, %v702_v56  ;;  %v704_v59 = vpop.f32.mrb[2].mxu0  ;;  %v744_v60 = vpop.f32.mrb[2].mxu1  ;;  %v2872_v51 = vld [vmem:[%s3736_s21] sm:$0xff]   ;;  %v2877_v56 = vld [vmem:[%s3736_s21 + $0x28] sm:$0xff]  }
 0x30e   : > { %v752_v61 = vpack.c.bf16 %v751_v55, %v751_v55  ;;  %v705_v63 = vpop.f32.mrb[3].mxu0  ;;  %v2493_v0 = vpop.f32.mrb[3].mxu1  ;;  %v764_v5 = vpack.c.bf16 %v763_v62, %v763_v62  ;;  %2519 = vmatpush3.bf16.msra.mxu0 %v2872_v51  ;;  %v2876_v55 = vld [vmem:[%s3736_s21 + $0x20] sm:$0xff]   ;;  %v2879_v59 = vld [vmem:[%s3736_s21 + $0x38] sm:$0xff]  }
 0x30f   : > { %v758_v2 = vpack.c.bf16 %v757_v58, %v757_v58  ;;  %2520 = vmatprep.subr.bf16.mxu0 %v3302_v4  ;;  %v2878_v58 = vld [vmem:[%s3736_s21 + $0x30] sm:$0xff]  }
 0x310   : > { %877 = vrot.lane.b32.xlu0 %v752_v61, %s3305_s14  ;;  %v829_v6 = vsel %vm827_vm2, %v764_v5, 0 }
 0x311   : > { %v770_v3 = vsel %vm765_vm1, %v758_v2, 0 }
 0x312   : > { %2495 = vmatpush3.bf16.xpose.msra.mxu1 %v770_v3  ;;  %2521 = vmatpush3.bf16.msra.mxu0 %v2873_v52 }
 0x313   : > { %2500 = vmatprep.subr.bf16.mxu1 %v3302_v4  ;;  %2522 = vmatprep.subr.bf16.mxu0 %v3302_v4 }
 0x314   : > { %940 = vrot.lane.b32.xlu0 %v764_v5, %s3305_s14 }
 0x316   : > { %2523 = vmatpush3.bf16.msra.mxu0 %v2874_v53  ;;  %v2896_v53 = vld [vmem:[%s3744_s12 + $0x40] sm:$0xff]  }
 0x317   : > { %2524 = vmatprep.subr.bf16.mxu0 %v3302_v4 }
 0x319   : > { %2497 = vmatmul.mubr.msk.bf16.vlgmr.msra.gmra.mrb[4].mxu1 %vm765_vm1, %v752_v61 }
 0x31a   : > { %2501 = vmatpush3.bf16.msra.mxu1 %v829_v6  ;;  %2502 = vmatprep.mubr.msk.bf16.mxu1 %vm3304_vm0, %v3302_v4 }
 0x31b   : > { %2506 = vmatprep.subr.bf16.mxu1 %v3302_v4  ;;  %2525 = vmatpush3.bf16.msra.mxu0 %v2875_v54  ;;  %v2897_v54 = vld [vmem:[%s3744_s12] sm:$0xff]  }
 0x31c   : > { %2526 = vmatprep.subr.bf16.mxu0 %v3302_v4 }
 0x31f   : > { %2527 = vmatpush3.bf16.msra.mxu0 %v2876_v55  ;;  %v2899_v55 = vld [vmem:[%s3744_s12 + $0x8] sm:$0xff]  }
 0x320   : > { %2528 = vmatprep.subr.bf16.mxu0 %v3302_v4 }
 0x323   : > { %2529 = vmatpush3.bf16.msra.mxu0 %v2877_v56  ;;  %v2900_v56 = vld [vmem:[%s3744_s12 + $0x50] sm:$0xff]  }
 0x324   : > { %2530 = vmatprep.subr.bf16.mxu0 %v3302_v4 }
 0x327   : > { %2531 = vmatpush3.bf16.msra.mxu0 %v2878_v58  ;;  %v2902_v58 = vld [vmem:[%s3744_s12 + $0x58] sm:$0xff]  }
 0x328   : > { %2532 = vmatprep.subr.bf16.mxu0 %v3302_v4 }
 0x32b   : > { %2533 = vmatpush3.bf16.msra.mxu0 %v2879_v59  ;;  %v2903_v59 = vld [vmem:[%s3744_s12 + $0x18] sm:$0xff]  }
 0x32c   : > { %2558 = vmatprep.subr.bf16.mxu0 %v3302_v4 }
 0x382   : > { %v878_v19 = vpop.permute.xlu0 %877 }
 0x386   : > { %v941_v21 = vpop.permute.xlu0 %940 }
 0x387   : > { %v946_v22 = vsel %vm827_vm2, %v941_v21, 0 }
 0x3ec   : > { %v806_v7 = vpop.f32.mrb[4].mxu1 }
 0x3ed   : > { %v812_v8 = vmul.f32 0.125, %v806_v7  ;;  %v2498_v9 = vpop.f32.mrb[5].mxu1  ;;  %v1107_v7 = vsub.s32 5, %v3793_v36 }
 0x3ee   : > { %v809_v10 = vpop.f32.mrb[6].mxu1 }
 0x3ef   : > { %v2499_v11 = vpop.f32.mrb[7].mxu1  ;;  %v814_v12 = vsel %vm813_vm3, %v812_v8, -inf }
 0x3f0   : > { %815 = vmax.xlane.f32.xlu1 %v814_v12 }
 0x401   : > { %880 = vrot.lane.b32.xlu1 %v758_v2, %s3305_s14 }
 0x47d   : > { %v816_v13 = vpop.xlane.xlu1 %815 }
 0x47e   : > { %v817_v14 = vsub.f32 %v812_v8, %v816_v13  ;;  %v1108_v8 = vrot.slane %v3797_v38, %v1107_v7 }
 0x480   : > { %v818_v15 = vmul.f32 1.442695, %v817_v14 }
 0x481   : > { %v881_v17 = vpop.permute.xlu1 %880 }
 0x482   : > { %2946 = vpow2.f32 %v818_v15  ;;  %v886_v20 = vsel %vm765_vm1, %v881_v17, 0  ;;  %v2880_v15 = vld [vmem:[%s3742_s26] ss:$16 sps:$4 sm:$0xff]  }
 0x483   : > { %v2882_v17 = vld [vmem:[%s3742_s26 + $0x20] ss:$16 sps:$4 sm:$0xff]  }
 0x48c   : > { %v2947_v16 = vpop.eup %2946 }
 0x48d   : > { %v823_v18 = vpack.c.bf16 %v2947_v16, %v2947_v16  ;;  %v820_v33 = vsel %vm813_vm3, %v2947_v16, 0.0  ;;  %v2881_v16 = vld [vmem:[%s3742_s26 + $0x4] ss:$16 sps:$4 sm:$0xff]  }
 0x48f   : > { %2503 = vmatmul.mubr.msk.bf16.vlgmr.msra.gmra.mrb[8].mxu1 %vm813_vm3, %v823_v18  ;;  %v2883_v18 = vld [vmem:[%s3742_s26 + $0x24] ss:$16 sps:$4 sm:$0xff]  }
 0x490   : > { %2507 = vmatpush3.bf16.xpose.msra.mxu1 %v886_v20  ;;  %2508 = vmatprep.mubr.msk.bf16.mxu1 %vm3304_vm0, %v3302_v4 }
 0x491   : > { %2512 = vmatprep.subr.bf16.mxu1 %v3302_v4 }
 0x497   : > { %2509 = vmatmul.mubr.msk.bf16.vlgmr.msra.gmra.mrb[12].mxu1 %vm765_vm1, %v878_v19 }
 0x498   : > { %2513 = vmatpush3.bf16.msra.mxu1 %v946_v22  ;;  %2514 = vmatprep.mubr.msk.bf16.mxu1 %vm3304_vm0, %v3302_v4  ;;  %v2884_v22 = vld [vmem:[%s3742_s26 + $0x40] ss:$16 sps:$4 sm:$0xff]  }
 0x499   : > { %2538 = vmatprep.subr.bf16.mxu1 %v3302_v4 }
 0x562   : > { %v865_v23 = vpop.f32.mrb[8].mxu1 }
 0x563   : > { %v2504_v24 = vpop.f32.mrb[9].mxu1 }
 0x564   : > { %v868_v25 = vpop.f32.mrb[10].mxu1  ;;  %v2886_v24 = vld [vmem:[%s3742_s26 + $0x60] ss:$16 sps:$4 sm:$0xff]  }
 0x565   : > { %v2505_v26 = vpop.f32.mrb[11].mxu1  ;;  %v2887_v25 = vld [vmem:[%s3742_s26 + $0x64] ss:$16 sps:$4 sm:$0xff]  }
 0x566   : > { %v2888_v26 = vld [vmem:[%s3742_s26 + $0x80] ss:$16 sps:$4 sm:$0xff]  }
 0x56a   : > { %v922_v27 = vpop.f32.mrb[12].mxu1 }
 0x56b   : > { %v928_v28 = vmul.f32 0.125, %v922_v27  ;;  %v2510_v29 = vpop.f32.mrb[13].mxu1  ;;  %v2889_v27 = vld [vmem:[%s3742_s26 + $0x84] ss:$16 sps:$4 sm:$0xff]  }
 0x56c   : > { %v925_v30 = vpop.f32.mrb[14].mxu1  ;;  %v2891_v29 = vld [vmem:[%s3742_s26 + $0xa4] ss:$16 sps:$4 sm:$0xff]  }
 0x56d   : > { %v2511_v31 = vpop.f32.mrb[15].mxu1  ;;  %v929_v32 = vsel %vm813_vm3, %v928_v28, -inf  ;;  %v2892_v30 = vld [vmem:[%s3742_s26 + $0xc0] ss:$16 sps:$4 sm:$0xff]  }
 0x56e   : > { %930 = vmax.xlane.f32.xlu1 %v929_v32  ;;  %v2893_v31 = vld [vmem:[%s3742_s26 + $0xc4] ss:$16 sps:$4 sm:$0xff]   ;;  %v2894_v32 = vld [vmem:[%s3742_s26 + $0xe0] ss:$16 sps:$4 sm:$0xff]  }
 0x572   : > { %821 = vadd.xlane.f32.xlu1 %v820_v33  ;;  %v2895_v33 = vld [vmem:[%s3742_s26 + $0xe4] ss:$16 sps:$4 sm:$0xff]  }
 0x5fb   : > { %v931_v34 = vpop.xlane.xlu1 %930 }
 0x5fc   : > { %v932_v35 = vsub.f32 %v928_v28, %v931_v34  ;;  %v2890_v28 = vld [vmem:[%s3742_s26 + $0xa0] ss:$16 sps:$4 sm:$0xff]  }
 0x5fe   : > { %v933_v40 = vmul.f32 1.442695, %v932_v35 }
 0x5ff   : > { %v822_v41 = vpop.xlane.xlu1 %821 }
 0x600   : > { %2948 = vpow2.f32 %v933_v40 }
 0x601   : > { %2950 = vrcp.f32 %v822_v41  ;;  %v1123_v41 = vsub.s32 6, %v3793_v36 }
 0x60a   : > { %v2949_v42 = vpop.eup %2948 }
 0x60b   : > { %v2951_v43 = vpop.eup %2950  ;;  %v935_v44 = vsel %vm813_vm3, %v2949_v42, 0.0  ;;  %v938_v45 = vpack.c.bf16 %v2949_v42, %v2949_v42  ;;  %v1128_v42 = vsub.s32 7, %v3793_v36 }
 0x60c   : > { %936 = vadd.xlane.f32.xlu0 %v935_v44  ;;  %v872_v46 = vmul.f32 %v2951_v43, %v865_v23  ;;  %v2885_v23 = vld [vmem:[%s3742_s26 + $0x44] ss:$16 sps:$4 sm:$0xff]   ;;  %v1124_v43 = vrot.slane %v3797_v38, %v1123_v41  ;;  %v2918_v41 = vld [vmem:[%s3742_s26 + $0xc8] ss:$16 sps:$4 sm:$0xff]  }
 0x60d   : > { %2515 = vmatmul.mubr.msk.bf16.vlgmr.msra.gmra.mrb[16].mxu1 %vm813_vm3, %v938_v45 }
 0x60e   : > { %v873_v50 = vpack.c.bf16 %v872_v46, %v872_v46  ;;  %2554 = vmatprep.mubr.msk.bf16.mxu1 %vm3304_vm0, %v3302_v4  ;;  %2539 = vmatpush3.bf16.msra.mxu1 %v2880_v15  ;;  %v1129_v46 = vrot.slane %v3797_v38, %v1128_v42  ;;  %v2898_v38 = vld [vmem:[%s3744_s12 + $0x48] sm:$0xff]  }
 0x60f   : > { %2540 = vmatprep.subr.bf16.mxu1 %v3302_v4  ;;  %v2919_v42 = vld [vmem:[%s3742_s26 + $0xe8] ss:$16 sps:$4 sm:$0xff]  }
 0x610   : > { %875 = vst.msk [vmem:[#allocation3] sm:$0xf] %vm874_vm4, %v873_v50 }
 0x612   : > { %2541 = vmatpush3.bf16.msra.mxu1 %v2882_v17 }
 0x613   : > { %2542 = vmatprep.subr.bf16.mxu1 %v3302_v4 }
 0x616   : > { %2543 = vmatpush3.bf16.msra.mxu1 %v2884_v22 }
 0x617   : > { %2544 = vmatprep.subr.bf16.mxu1 %v3302_v4 }
 0x61a   : > { %2545 = vmatpush3.bf16.msra.mxu1 %v2886_v24 }
 0x61b   : > { %2546 = vmatprep.subr.bf16.mxu1 %v3302_v4 }
 0x61e   : > { %2547 = vmatpush3.bf16.msra.mxu1 %v2888_v26 }
 0x61f   : > { %2548 = vmatprep.subr.bf16.mxu1 %v3302_v4 }
 0x622   : > { %2549 = vmatpush3.bf16.msra.mxu1 %v2890_v28 }
 0x623   : > { %2550 = vmatprep.subr.bf16.mxu1 %v3302_v4 }
 0x626   : > { %2551 = vmatpush3.bf16.msra.mxu1 %v2892_v30  ;;  %v2912_v30 = vld [vmem:[%s3742_s26 + $0x8] ss:$16 sps:$4 sm:$0xff]  }
 0x627   : > { %2552 = vmatprep.subr.bf16.mxu1 %v3302_v4 }
 0x62a   : > { %2553 = vmatpush3.bf16.msra.mxu1 %v2894_v32  ;;  %v2913_v32 = vld [vmem:[%s3742_s26 + $0x28] ss:$16 sps:$4 sm:$0xff]  }
 0x62b   : > { %2578 = vmatprep.subr.bf16.mxu1 %v3302_v4 }
 0x699   : > { %v937_v57 = vpop.xlane.xlu0 %936 }
 0x69a   : > { %2952 = vrcp.f32 %v937_v57  ;;  %v2901_v57 = vld [vmem:[%s3744_s12 + $0x10] sm:$0xff]  }
 0x6a4   : > { %v2953_v60 = vpop.eup %2952 }
 0x6e0   : > { %v982_v61 = vpop.f32.mrb[16].mxu1 }
 0x6e1   : > { %v989_v62 = vmul.f32 %v2953_v60, %v982_v61  ;;  %v2516_v63 = vpop.f32.mrb[17].mxu1  ;;  %v2904_v60 = vld [vmem:[%s3744_s12 + $0x60] sm:$0xff]  }
 0x6e2   : > { %v985_v0 = vpop.f32.mrb[18].mxu1  ;;  %v2905_v61 = vld [vmem:[%s3744_s12 + $0x20] sm:$0xff]   ;;  %v2907_v63 = vld [vmem:[%s3744_s12 + $0x28] sm:$0xff]  }
 0x6e3   : > { %v2375_v2 = vpack.c.bf16 %v989_v62, %v989_v62  ;;  %v2517_v3 = vpop.f32.mrb[19].mxu1  ;;  %v2906_v62 = vld [vmem:[%s3744_s12 + $0x68] sm:$0xff]   ;;  %v2908_v0 = vld [vmem:[%s3744_s12 + $0x70] sm:$0xff]  }
 0x6e4   : > { %v2910_v3 = vld [vmem:[%s3744_s12 + $0x78] sm:$0xff]  }
 0x6e5   : > { %994 = vrot.lane.b32.xlu1 %v2375_v2, %s3305_s14  ;;  %v2909_v2 = vld [vmem:[%s3744_s12 + $0x30] sm:$0xff]  }
 0x757   : > { %v995_v5 = vpop.permute.xlu1 %994 }
 0x758   : > { %998 = vst.msk [vmem:[#allocation3] sm:$0xf] %vm997_vm5, %v995_v5  ;;  %v2911_v5 = vld [vmem:[%s3744_s12 + $0x38] sm:$0xff]  }
 0x75f   : > { %v999_v6 = vld [vmem:[#allocation3] sm:$0xf] }
 0x760   : > { %2535 = vmatmul.mubr.bf16.vlgmr.msra.gmra.mrb[4].mxu0 %v999_v6  ;;  %v3952_v6 = vld [vmem:[%s3728_s30 + $0x8] sm:$0xff] }
 0x761   : > { %2574 = vmatprep.mubr.msk.bf16.mxu0 %vm3304_vm0, %v3302_v4  ;;  %2559 = vmatpush3.bf16.msra.mxu0 %v2881_v16  ;;  %v1151_v7 = vrot.slane %v3952_v6, %v497_v37 }
 0x762   : > { %2560 = vmatprep.subr.bf16.mxu0 %v3302_v4 }
 0x765   : > { %2561 = vmatpush3.bf16.msra.mxu0 %v2883_v18 }
 0x766   : > { %2562 = vmatprep.subr.bf16.mxu0 %v3302_v4 }
 0x769   : > { %2563 = vmatpush3.bf16.msra.mxu0 %v2885_v23 }
 0x76a   : > { %2564 = vmatprep.subr.bf16.mxu0 %v3302_v4 }
 0x76d   : > { %2565 = vmatpush3.bf16.msra.mxu0 %v2887_v25 }
 0x76e   : > { %2566 = vmatprep.subr.bf16.mxu0 %v3302_v4 }
 0x771   : > { %2567 = vmatpush3.bf16.msra.mxu0 %v2889_v27 }
 0x772   : > { %2568 = vmatprep.subr.bf16.mxu0 %v3302_v4 }
 0x775   : > { %2569 = vmatpush3.bf16.msra.mxu0 %v2891_v29 }
 0x776   : > { %2570 = vmatprep.subr.bf16.mxu0 %v3302_v4 }
 0x779   : > { %2571 = vmatpush3.bf16.msra.mxu0 %v2893_v31 }
 0x77a   : > { %2572 = vmatprep.subr.bf16.mxu0 %v3302_v4 }
 0x77d   : > { %2573 = vmatpush3.bf16.msra.mxu0 %v2895_v33  ;;  %v2914_v33 = vld [vmem:[%s3742_s26 + $0x48] ss:$16 sps:$4 sm:$0xff]  }
 0x77e   : > { %2598 = vmatprep.subr.bf16.mxu0 %v3302_v4 }
 0x833   : > { %v1098_v9 = vpop.f32.mrb[4].mxu0 }
 0x834   : > { %v1104_v10 = vadd.f32 %v1098_v9, %v3753_v1  ;;  %v2536_v11 = vpop.f32.mrb[5].mxu0 }
 0x835   : > { %v1101_v12 = vpop.f32.mrb[6].mxu0 }
 0x836   : > { %v3871_v13 = vadd.f32 %v1108_v8, %v1104_v10  ;;  %v2537_v14 = vpop.f32.mrb[7].mxu0  ;;  %v1284_v8 = vrot.slane %v3952_v6, %v502_v39 }
 0x838   : > { %1110 = vadd.xlane.f32.xlu0 %v3871_v13 }
 0x8c5   : > { %v1111_v1 = vpop.xlane.xlu0 %1110 }
 0x8c6   : > { %v1112_v19 = vmul.f32 0.0078125, %v1111_v1 }
 0x8c8   : > { %v1113_v20 = vsub.f32 %v3871_v13, %v1112_v19 }
 0x8ca   : > { %v1114_v21 = vmul.f32 %v1113_v20, %v1113_v20 }
 0x8cc   : > { %1115 = vadd.xlane.f32.xlu0 %v1114_v21 }
 0x959   : > { %v1116_v34 = vpop.xlane.xlu0 %1115 }
 0x95a   : > { %v1117_v35 = vmul.f32 0.0078125, %v1116_v34  ;;  %v2915_v34 = vld [vmem:[%s3742_s26 + $0x68] ss:$16 sps:$4 sm:$0xff]  }
 0x95c   : > { %v1118_v40 = vadd.f32 1e-05, %v1117_v35  ;;  %v2916_v35 = vld [vmem:[%s3742_s26 + $0x88] ss:$16 sps:$4 sm:$0xff]  }
 0x95e   : > { %2954 = vrsqrt.f32 %v1118_v40  ;;  %v2917_v40 = vld [vmem:[%s3742_s26 + $0xa8] ss:$16 sps:$4 sm:$0xff]  }
 0x968   : > { %v2955_v44 = vpop.eup %2954 }
 0x969   : > { %v1120_v45 = vmul.f32 %v2955_v44, %v1113_v20  ;;  %v2921_v44 = vld [vmem:[%s3742_s26 + $0x2c] ss:$16 sps:$4 sm:$0xff]  }
 0x96b   : > { %v1125_v50 = vmul.f32 %v1124_v43, %v1120_v45  ;;  %v2920_v43 = vld [vmem:[%s3742_s26 + $0xc] ss:$16 sps:$4 sm:$0xff]  }
 0x96c   : > { %v2922_v45 = vld [vmem:[%s3742_s26 + $0x4c] ss:$16 sps:$4 sm:$0xff]  }
 0x96d   : > { %v1130_v51 = vadd.f32 %v1129_v46, %v1125_v50  ;;  %v2923_v46 = vld [vmem:[%s3742_s26 + $0x6c] ss:$16 sps:$4 sm:$0xff]  }
 0x96e   : > { %v2924_v50 = vld [vmem:[%s3742_s26 + $0x8c] ss:$16 sps:$4 sm:$0xff]  }
 0x96f   : > { %v3911_v52 = vpack.c.bf16 %v1130_v51, %v1130_v51  ;;  %v2925_v51 = vld [vmem:[%s3742_s26 + $0xac] ss:$16 sps:$4 sm:$0xff]  }
 0x971   : > { %2555 = vmatmul.mubr.bf16.vlgmr.msra.gmra.mrb[20].mxu1 %v3911_v52  ;;  %2575 = vmatmul.mubr.bf16.vlgmr.msra.gmra.mrb[8].mxu0 %v3911_v52 }
 0x972   : > { %2594 = vmatprep.mubr.msk.bf16.mxu1 %vm3304_vm0, %v3302_v4  ;;  %2614 = vmatprep.mubr.msk.bf16.mxu0 %vm3304_vm0, %v3302_v4 }
 0x973   : > { %2579 = vmatpush3.bf16.msra.mxu1 %v2896_v53  ;;  %2599 = vmatpush3.bf16.msra.mxu0 %v2897_v54  ;;  %v2926_v53 = vld [vmem:[%s3742_s26 + $0xcc] ss:$16 sps:$4 sm:$0xff]  }
 0x974   : > { %2580 = vmatprep.subr.bf16.mxu1 %v3302_v4  ;;  %2600 = vmatprep.subr.bf16.mxu0 %v3302_v4  ;;  %v2927_v54 = vld [vmem:[%s3742_s26 + $0xec] ss:$16 sps:$4 sm:$0xff]  }
 0x977   : > { %2581 = vmatpush3.bf16.msra.mxu1 %v2898_v38  ;;  %2601 = vmatpush3.bf16.msra.mxu0 %v2899_v55  ;;  %v2928_v38 = vld [vmem:[%s3744_s12 + $0x80] sm:$0xff]   ;;  %v2929_v55 = vld [vmem:[%s3744_s12 + $0x88] sm:$0xff]  }
 0x978   : > { %2582 = vmatprep.subr.bf16.mxu1 %v3302_v4  ;;  %2602 = vmatprep.subr.bf16.mxu0 %v3302_v4 }
 0x97b   : > { %2583 = vmatpush3.bf16.msra.mxu1 %v2900_v56  ;;  %2603 = vmatpush3.bf16.msra.mxu0 %v2901_v57  ;;  %v2930_v56 = vld [vmem:[%s3744_s12 + $0x90] sm:$0xff]   ;;  %v2931_v57 = vld [vmem:[%s3744_s12 + $0x98] sm:$0xff]  }
 0x97c   : > { %2584 = vmatprep.subr.bf16.mxu1 %v3302_v4  ;;  %2604 = vmatprep.subr.bf16.mxu0 %v3302_v4 }
 0x97f   : > { %2585 = vmatpush3.bf16.msra.mxu1 %v2902_v58  ;;  %2605 = vmatpush3.bf16.msra.mxu0 %v2903_v59  ;;  %v2933_v58 = vld [vmem:[%s3744_s12 + $0xa8] sm:$0xff]   ;;  %v2934_v59 = vld [vmem:[%s3744_s12 + $0xb0] sm:$0xff]  }
 0x980   : > { %2586 = vmatprep.subr.bf16.mxu1 %v3302_v4  ;;  %2606 = vmatprep.subr.bf16.mxu0 %v3302_v4 }
 0x983   : > { %2587 = vmatpush3.bf16.msra.mxu1 %v2904_v60  ;;  %2607 = vmatpush3.bf16.msra.mxu0 %v2905_v61  ;;  %v2935_v60 = vld [vmem:[%s3744_s12 + $0xb8] sm:$0xff]  }
 0x984   : > { %2588 = vmatprep.subr.bf16.mxu1 %v3302_v4  ;;  %2608 = vmatprep.subr.bf16.mxu0 %v3302_v4 }
 0x987   : > { %2589 = vmatpush3.bf16.msra.mxu1 %v2906_v62  ;;  %2609 = vmatpush3.bf16.msra.mxu0 %v2907_v63 }
 0x988   : > { %2590 = vmatprep.subr.bf16.mxu1 %v3302_v4  ;;  %2610 = vmatprep.subr.bf16.mxu0 %v3302_v4 }
 0x98b   : > { %2591 = vmatpush3.bf16.msra.mxu1 %v2908_v0  ;;  %2611 = vmatpush3.bf16.msra.mxu0 %v2909_v2 }
 0x98c   : > { %2592 = vmatprep.subr.bf16.mxu1 %v3302_v4  ;;  %2612 = vmatprep.subr.bf16.mxu0 %v3302_v4 }
 0x98f   : > { %2593 = vmatpush3.bf16.msra.mxu1 %v2910_v3  ;;  %2613 = vmatpush3.bf16.msra.mxu0 %v2911_v5 }
 0x990   : > { %2618 = vmatprep.subr.bf16.mxu1 %v3302_v4  ;;  %2638 = vmatprep.subr.bf16.mxu0 %v3302_v4 }
 0xa44   : > { %v1234_v9 = vpop.f32.mrb[20].mxu1  ;;  %v1367_v10 = vpop.f32.mrb[8].mxu0 }
 0xa45   : > { %v1235_v11 = vadd.f32 %v1234_v9, %v1151_v7  ;;  %v1368_v12 = vadd.f32 %v1367_v10, %v1284_v8  ;;  %v2556_v14 = vpop.f32.mrb[21].mxu1  ;;  %v2576_v15 = vpop.f32.mrb[9].mxu0  ;;  %v1593_v9 = vrot.slane %v3952_v6, %v749_v47 }
 0xa46   : > { %v1237_v16 = vpop.f32.mrb[22].mxu1  ;;  %v1370_v17 = vpop.f32.mrb[10].mxu0 }
 0xa47   : > { %v2306_v18 = vmul.f32 -1.702, %v1235_v11  ;;  %v2315_v1 = vmul.f32 -1.702, %v1368_v12  ;;  %v2557_v19 = vpop.f32.mrb[23].mxu1  ;;  %v2577_v20 = vpop.f32.mrb[11].mxu0 }
 0xa48   : > { %v1815_v19 = vrot.slane %v3952_v6, %v755_v48 }
 0xa49   : > { %v1242_v21 = vmul.f32 1.442695, %v2306_v18  ;;  %v1375_v22 = vmul.f32 1.442695, %v2315_v1 }
 0xa4b   : > { %2956 = vpow2.f32 %v1242_v21 }
 0xa4c   : > { %2958 = vpow2.f32 %v1375_v22  ;;  %v2936_v22 = vld [vmem:[%s3744_s12 + $0xc0] sm:$0xff]  }
 0xa55   : > { %v2957_v37 = vpop.eup %2956 }
 0xa56   : > { %v2959_v23 = vpop.eup %2958  ;;  %v1244_v39 = vadd.f32 1.0, %v2957_v37 }
 0xa57   : > { %v1377_v24 = vadd.f32 1.0, %v2959_v23 }
 0xa58   : > { %2960 = vrcp.f32 %v1244_v39 }
 0xa59   : > { %2962 = vrcp.f32 %v1377_v24 }
 0xa62   : > { %v2961_v25 = vpop.eup %2960 }
 0xa63   : > { %v2963_v26 = vpop.eup %2962  ;;  %v1247_v27 = vmul.f32 %v2961_v25, %v1235_v11 }
 0xa64   : > { %v1380_v28 = vmul.f32 %v2963_v26, %v1368_v12 }
 0xa65   : > { %v1248_v29 = vpack.c.bf16 %v1247_v27, %v1247_v27  ;;  %v2937_v27 = vld [vmem:[%s3744_s12 + $0xc8] sm:$0xff]  }
 0xa66   : > { %v1381_v31 = vpack.c.bf16 %v1380_v28, %v1380_v28  ;;  %v2938_v28 = vld [vmem:[%s3744_s12 + $0xd0] sm:$0xff]  }
 0xa67   : > { %2615 = vmatmul.mubr.bf16.vlgmr.msra.gmra.mrb[12].mxu0 %v1248_v29  ;;  %v2939_v29 = vld [vmem:[%s3744_s12 + $0xd8] sm:$0xff]  }
 0xa68   : > { %2595 = vmatmul.mubr.bf16.vlgmr.msra.gmra.mrb[24].mxu1 %v1381_v31  ;;  %2654 = vmatprep.mubr.msk.bf16.mxu0 %vm3304_vm0, %v3302_v4 }
 0xa69   : > { %2619 = vmatpush3.bf16.msra.mxu1 %v2912_v30  ;;  %2634 = vmatprep.mubr.msk.bf16.mxu1 %vm3304_vm0, %v3302_v4  ;;  %v2940_v30 = vld [vmem:[%s3744_s12 + $0xe0] sm:$0xff]  }
 0xa6a   : > { %2620 = vmatprep.subr.bf16.mxu1 %v3302_v4  ;;  %2639 = vmatpush3.bf16.msra.mxu0 %v2928_v38 }
 0xa6b   : > { %2640 = vmatprep.subr.bf16.mxu0 %v3302_v4 }
 0xa6d   : > { %2621 = vmatpush3.bf16.msra.mxu1 %v2913_v32 }
 0xa6e   : > { %2622 = vmatprep.subr.bf16.mxu1 %v3302_v4  ;;  %2641 = vmatpush3.bf16.msra.mxu0 %v2929_v55 }
 0xa6f   : > { %2642 = vmatprep.subr.bf16.mxu0 %v3302_v4 }
 0xa71   : > { %2623 = vmatpush3.bf16.msra.mxu1 %v2914_v33  ;;  %v2941_v33 = vld [vmem:[%s3744_s12 + $0xe8] sm:$0xff]  }
 0xa72   : > { %2624 = vmatprep.subr.bf16.mxu1 %v3302_v4  ;;  %2643 = vmatpush3.bf16.msra.mxu0 %v2930_v56 }
 0xa73   : > { %2644 = vmatprep.subr.bf16.mxu0 %v3302_v4 }
 0xa75   : > { %2625 = vmatpush3.bf16.msra.mxu1 %v2915_v34  ;;  %v2942_v34 = vld [vmem:[%s3744_s12 + $0xf0] sm:$0xff]  }
 0xa76   : > { %2626 = vmatprep.subr.bf16.mxu1 %v3302_v4  ;;  %2645 = vmatpush3.bf16.msra.mxu0 %v2931_v57 }
 0xa77   : > { %2646 = vmatprep.subr.bf16.mxu0 %v3302_v4 }
 0xa79   : > { %2627 = vmatpush3.bf16.msra.mxu1 %v2916_v35  ;;  %v2943_v35 = vld [vmem:[%s3744_s12 + $0xf8] sm:$0xff]  }
 0xa7a   : > { %2628 = vmatprep.subr.bf16.mxu1 %v3302_v4 }
 0xa7d   : > { %2629 = vmatpush3.bf16.msra.mxu1 %v2917_v40 }
 0xa7e   : > { %2630 = vmatprep.subr.bf16.mxu1 %v3302_v4 }
 0xa81   : > { %2631 = vmatpush3.bf16.msra.mxu1 %v2918_v41 }
 0xa82   : > { %2632 = vmatprep.subr.bf16.mxu1 %v3302_v4 }
 0xa85   : > { %2633 = vmatpush3.bf16.msra.mxu1 %v2919_v42 }
 0xa86   : > { %2658 = vmatprep.subr.bf16.mxu1 %v3302_v4 }
 0xa88   : > { %2635 = vmatmul.mubr.bf16.vlgmr.msra.gmra.mrb[28].mxu1 %v3911_v52 }
 0xa89   : > { %2659 = vmatpush3.bf16.msra.mxu1 %v2920_v43  ;;  %2674 = vmatprep.mubr.msk.bf16.mxu1 %vm3304_vm0, %v3302_v4 }
 0xa8a   : > { %2660 = vmatprep.subr.bf16.mxu1 %v3302_v4 }
 0xa8d   : > { %2661 = vmatpush3.bf16.msra.mxu1 %v2921_v44 }
 0xa8e   : > { %2662 = vmatprep.subr.bf16.mxu1 %v3302_v4 }
 0xa91   : > { %2663 = vmatpush3.bf16.msra.mxu1 %v2922_v45 }
 0xa92   : > { %2664 = vmatprep.subr.bf16.mxu1 %v3302_v4 }
 0xa95   : > { %2665 = vmatpush3.bf16.msra.mxu1 %v2923_v46 }
 0xa96   : > { %2666 = vmatprep.subr.bf16.mxu1 %v3302_v4 }
 0xa99   : > { %2667 = vmatpush3.bf16.msra.mxu1 %v2924_v50 }
 0xa9a   : > { %2668 = vmatprep.subr.bf16.mxu1 %v3302_v4 }
 0xa9d   : > { %2669 = vmatpush3.bf16.msra.mxu1 %v2925_v51 }
 0xa9e   : > { %2670 = vmatprep.subr.bf16.mxu1 %v3302_v4 }
 0xaa1   : > { %2671 = vmatpush3.bf16.msra.mxu1 %v2926_v53 }
 0xaa2   : > { %2672 = vmatprep.subr.bf16.mxu1 %v3302_v4 }
 0xaa5   : > { %2673 = vmatpush3.bf16.msra.mxu1 %v2927_v54  ;;  %v2022_v54 = vrot.slane %v3952_v6, %v761_v49 }
 0xaa8   : > { %2675 = vmatmul.mubr.bf16.vlgmr.msra.gmra.mrb[32].mxu1 %v3911_v52  ;;  %v2932_v52 = vld [vmem:[%s3744_s12 + $0xa0] sm:$0xff]  }
 0xaa9   : > { %2647 = vmatpush3.bf16.msra.mxu0 %v2932_v52 }
 0xaaa   : > { %2648 = vmatprep.subr.bf16.mxu0 %v3302_v4 }
 0xaad   : > { %2649 = vmatpush3.bf16.msra.mxu0 %v2933_v58 }
 0xaae   : > { %2650 = vmatprep.subr.bf16.mxu0 %v3302_v4 }
 0xab1   : > { %2651 = vmatpush3.bf16.msra.mxu0 %v2934_v59 }
 0xab2   : > { %2652 = vmatprep.subr.bf16.mxu0 %v3302_v4 }
 0xab5   : > { %2653 = vmatpush3.bf16.msra.mxu0 %v2935_v60 }
 0xab6   : > { %2678 = vmatprep.subr.bf16.mxu0 %v3302_v4 }
 0xb3a   : > { %v1568_v61 = vpop.f32.mrb[12].mxu0 }
 0xb3b   : > { %v1480_v62 = vpop.f32.mrb[24].mxu1  ;;  %v2616_v63 = vpop.f32.mrb[13].mxu0 }
 0xb3c   : > { %v4015_v0 = vadd.f32 %v1568_v61, %v1480_v62  ;;  %v2596_v2 = vpop.f32.mrb[25].mxu1  ;;  %v1571_v3 = vpop.f32.mrb[14].mxu0 }
 0xb3d   : > { %v1483_v5 = vpop.f32.mrb[26].mxu1  ;;  %v2617_v7 = vpop.f32.mrb[15].mxu0 }
 0xb3e   : > { %v2597_v8 = vpop.f32.mrb[27].mxu1 }
 0xb5b   : > { %v1676_v10 = vpop.f32.mrb[28].mxu1 }
 0xb5c   : > { %v1677_v11 = vadd.f32 %v1676_v10, %v1593_v9  ;;  %v2636_v12 = vpop.f32.mrb[29].mxu1 }
 0xb5d   : > { %v1679_v14 = vpop.f32.mrb[30].mxu1 }
 0xb5e   : > { %v2340_v15 = vmul.f32 -1.702, %v1677_v11  ;;  %v2637_v16 = vpop.f32.mrb[31].mxu1 }
 0xb60   : > { %v1684_v17 = vmul.f32 1.442695, %v2340_v15 }
 0xb62   : > { %2964 = vpow2.f32 %v1684_v17 }
 0xb6c   : > { %v2965_v18 = vpop.eup %2964 }
 0xb6d   : > { %v1686_v1 = vadd.f32 1.0, %v2965_v18 }
 0xb6f   : > { %2966 = vrcp.f32 %v1686_v1 }
 0xb79   : > { %v2967_v20 = vpop.eup %2966 }
 0xb7a   : > { %v1689_v21 = vmul.f32 %v2967_v20, %v1677_v11 }
 0xb7b   : > { %v1898_v47 = vpop.f32.mrb[32].mxu1 }
 0xb7c   : > { %v1690_v37 = vpack.c.bf16 %v1689_v21, %v1689_v21  ;;  %v1899_v23 = vadd.f32 %v1898_v47, %v1815_v19  ;;  %v2676_v39 = vpop.f32.mrb[33].mxu1 }
 0xb7d   : > { %v1901_v24 = vpop.f32.mrb[34].mxu1 }
 0xb7e   : > { %v2357_v25 = vmul.f32 -1.702, %v1899_v23  ;;  %2655 = vmatmul.mubr.bf16.vlgmr.msra.gmra.mrb[16].mxu0 %v1690_v37  ;;  %v2677_v26 = vpop.f32.mrb[35].mxu1 }
 0xb7f   : > { %2679 = vmatpush3.bf16.msra.mxu0 %v2936_v22  ;;  %2694 = vmatprep.mubr.msk.bf16.mxu0 %vm3304_vm0, %v3302_v4 }
 0xb80   : > { %v1906_v48 = vmul.f32 1.442695, %v2357_v25  ;;  %2680 = vmatprep.subr.bf16.mxu0 %v3302_v4 }
 0xb82   : > { %2968 = vpow2.f32 %v1906_v48 }
 0xb83   : > { %2681 = vmatpush3.bf16.msra.mxu0 %v2937_v27 }
 0xb84   : > { %2682 = vmatprep.subr.bf16.mxu0 %v3302_v4 }
 0xb87   : > { %2683 = vmatpush3.bf16.msra.mxu0 %v2938_v28 }
 0xb88   : > { %2684 = vmatprep.subr.bf16.mxu0 %v3302_v4 }
 0xb8b   : > { %2685 = vmatpush3.bf16.msra.mxu0 %v2939_v29 }
 0xb8c   : > { %v2969_v31 = vpop.eup %2968  ;;  %2686 = vmatprep.subr.bf16.mxu0 %v3302_v4 }
 0xb8d   : > { %v1908_v32 = vadd.f32 1.0, %v2969_v31 }
 0xb8f   : > { %2970 = vrcp.f32 %v1908_v32  ;;  %2687 = vmatpush3.bf16.msra.mxu0 %v2940_v30 }
 0xb90   : > { %2688 = vmatprep.subr.bf16.mxu0 %v3302_v4 }
 0xb93   : > { %2689 = vmatpush3.bf16.msra.mxu0 %v2941_v33 }
 0xb94   : > { %2690 = vmatprep.subr.bf16.mxu0 %v3302_v4 }
 0xb97   : > { %2691 = vmatpush3.bf16.msra.mxu0 %v2942_v34 }
 0xb98   : > { %2692 = vmatprep.subr.bf16.mxu0 %v3302_v4 }
 0xb99   : > { %v2971_v40 = vpop.eup %2970 }
 0xb9a   : > { %v1911_v41 = vmul.f32 %v2971_v40, %v1899_v23 }
 0xb9b   : > { %2693 = vmatpush3.bf16.msra.mxu0 %v2943_v35 }
 0xb9c   : > { %v1912_v42 = vpack.c.bf16 %v1911_v41, %v1911_v41 }
 0xb9e   : > { %2695 = vmatmul.mubr.bf16.vlgmr.msra.gmra.mrb[20].mxu0 %v1912_v42 }
 0xc51   : > { %v1789_v43 = vpop.f32.mrb[16].mxu0 }
 0xc52   : > { %v1795_v44 = vadd.f32 %v1789_v43, %v4015_v0  ;;  %v2656_v45 = vpop.f32.mrb[17].mxu0 }
 0xc53   : > { %v1792_v46 = vpop.f32.mrb[18].mxu0 }
 0xc54   : > { %v2657_v50 = vpop.f32.mrb[19].mxu0 }
 0xc71   : > { %v2011_v51 = vpop.f32.mrb[20].mxu0 }
 0xc72   : > { %v2017_v53 = vadd.f32 %v2011_v51, %v1795_v44  ;;  %v2696_v38 = vpop.f32.mrb[21].mxu0  ;;  %2028 = sbr.rel (%p2366_p5) target bundleno = 3193 (0xc79), region = 76 }
 0xc73   : > { %v2014_v55 = vpop.f32.mrb[22].mxu0 }
 0xc74   : > { %v2018_v4 = vadd.f32 %v2017_v53, %v3871_v13  ;;  %v2697_v56 = vpop.f32.mrb[23].mxu0 }
 0xc76   : > { %v2023_v57 = vadd.f32 %v2022_v54, %v2018_v4 }
 0xc78   : > { %2024 = vst [vmem:[#allocation2] sm:$0xff] %v2023_v57  ;;  %2029 = vst [vmem:[%s3750_s27] sm:$0xff] (!%p2366_p5), %v2023_v57 }
 0xc79 PF: > { %s4178_s18 = sld [smem:[#allocation25_spill]]  ;;  %s4179_s1 = sld [smem:[#allocation35_spill]] }
 0xc7a   : > { %s2044_s30 = sshll.u32 %s3750_s27, 4  ;;  %s2031_s23 = scalar_lea.sflag [#allocation6], %s3718_s11  ;;  %s2045_s30 = int_to_ptr.vmem [resolvable:$true] %s2044_s30 }
 0xc7b   : > { %s3152_s3 = scalar_lea.vmem %s2045_s30, 128  ;;  %p4180_p13 = scmp.ne.s32.totalorder %s4163_s8, 0 }
 0xc7c   : > { %p3153_p6 = scmp.ne.s32.totalorder %s2045_s30, %s3152_s3  ;;  %s3306_s9 = smov [#allocation15]  }
 0xc7d   : > { %s3156_s15 = sshll.u32 %s3306_s9, 4  ;;  %s3157_s15 = int_to_ptr.vmem [resolvable:$false] %s3156_s15 }
 0xc7e   : > { %p3154_p12 = pnand %p3153_p6, %p4180_p13  ;;  %s3158_s21 = scalar_lea.vmem %s3157_s15, 256 }
 0xc7f   : > { %s2368_s28 = sshll.u32 %s4178_s18, 7  ;;  %p3159_p10 = scmp.lt.s32.totalorder %s2045_s30, %s3157_s15 }
 0xc80   : > { %s4051_s20 = scalar_lea.hbm %s4179_s1, %s2368_s28  ;;  %p3155_p0 = pneg %p3154_p12 }
 0xc81   : > { %p3160_p2 = scmp.lt.s32.totalorder %s3158_s21, %s3152_s3 }
 0xc83   : > { %p3161_p3 = por %p3160_p2, %p3159_p10 }
 0xc85   : > { %p3162_p11 = pnand %p3161_p3, %p3155_p0 }
 0xc87   : > { %3165 = shalt.err (!%p3162_p11)
}
 0xc88   : > { %s3166_s11 = scalar_lea.hbm %s4051_s20, 128  ;;  %s3170_s19 = scalar_lea.hbm %s4179_s1, 256 }
 0xc89   : > { %p3167_p9 = scmp.ne.s32.totalorder %s4051_s20, %s3166_s11  ;;  %p3171_p1 = scmp.lt.u32.totalorder %s4051_s20, %s4179_s1 }
 0xc8a   : > { %p3172_p4 = scmp.lt.u32.totalorder %s3170_s19, %s3166_s11  ;;  %p3174_p6 = scmp.lt.u32.totalorder %s3166_s11, %s4051_s20 }
 0xc8b   : > { %p3168_p7 = pnand %p3167_p9, %p4180_p13 }
 0xc8c   : > { %p3173_p5 = por %p3172_p4, %p3171_p1 }
 0xc8d   : > { %p3169_p8 = pneg %p3168_p7 }
 0xc8e   : > { %p3175_p12 = por %p3174_p6, %p3173_p5 }
 0xc90   : > { %p3176_p0 = pnand %p3175_p12, %p3169_p8 }
 0xc92   : > { %3179 = shalt.err (!%p3176_p0)
}
 0xc93   : > { %2713 = dma.vmem_to_hbm [thread:$0]  (%p4180_p13), %s2045_s30, 128, %s4051_s20, %s2031_s23  }
 0xc94 PF: > { %p2739_p10 = scmp.ge.s32.totalorder %s3286_s7, 2  ;;  %s2056_s10 = sand.u32 1, %s3258_s24  }
 0xc95   : > { %p4181_p2 = scmp.ne.s32.totalorder %s4164_s22, 0  ;;  %s2057_s14 = scalar_lea.sflag [#allocation6], %s2056_s10 }
 0xc97   : > { %p2735_p3 = pnand %p2739_p10, %p4181_p2 }
 0xc99   : > { %3241 = dma.done.wait (!%p2735_p3), %s2057_s14, 128  }
 0xc9a   : > { %3243 = vsyncadd (!%p2735_p3), %s2057_s14, 4294967168  ;;  %s31_s7 = sadd.s32 1, %s3286_s7   ;;  %s4182_s21 = sld [smem:[#allocation21_spill]] }
 0xc9b   : > { %p28_p11 = scmp.ge.s32.totalorder %s31_s7, 6   ;;  %s4183_s22 = sld [smem:[#allocation22_spill]] }
 0xc9c   : > { %s4184_s23 = sld [smem:[#allocation31_spill]]  ;;  %s4185_s8 = sld [smem:[#allocation23_spill]] }
 0xc9d   : > { %s4186_s26 = sld [smem:[#allocation32_spill]]  ;;  %s4187_s28 = sld [smem:[#allocation26_spill]] }
 0xc9e   : > { %s4188_s16 = sld [smem:[#allocation28_spill]]  ;;  %s4189_s30 = sld [smem:[#allocation29_spill]] }
 0xc9f   : > { %s4190_s24 = smov %s3262_s25  ;;  %s4192_s27 = smov %s3278_s29 }
 0xca0   :  { %30 = sbr.rel (!%p28_p11) target bundleno = 19 (0x13), region = 158 }
 0xca2   : > { %s4191_s25 = smov %s4185_s8 }
 0xca4   : > { %s4193_s29 = smov %s4188_s16 }
 0xca7   :  { %2062 = vsyncpa [#allocation5], 1 }
 0xca8   :  { %2064 = vsyncpa [#allocation5 + $0x1], 1 }
 0xca9   :  { %2065 = vsyncpa [#allocation8], 1 }
 0xcaa   :  { %2067 = vsyncpa [#allocation8 + $0x1], 1 }
 0xcab   :  { %2068 = vsyncpa [#allocation11], 1 }
 0xcac   :  { %2070 = vsyncpa [#allocation11 + $0x1], 1 }
 0xcad   :  { %2071 = vsyncpa [#allocation14], 1 }
 0xcae   :  { %2073 = vsyncpa [#allocation14 + $0x1], 1 }
 0xcaf   :  { %2074 = vsyncpa [#allocation6], 1 }
 0xcb0   :  { %2076 = vsyncpa [#allocation6 + $0x1], 1 }

</bundles_post_ra>
